<compile_context>
chip_gen: v5e
topology: v5e:2x2
jax: 0.10.0
libtpu: 0.0.40
codegen_flags: <defaults>
</compile_context>

<pallas_src>
import functools
import math

import jax
import jax.numpy as jnp
from jax.experimental import pallas as pl
from jax.experimental.pallas import tpu as pltpu


# ----------------------------------------------------------------------------
# Fused kernel: encode one (x, y) pair (stacked along M) + partial MSE.
# ----------------------------------------------------------------------------
def _fused_perceptual_kernel(pair_ref, wt1_ref, b1_ref, wt2_ref, b2_ref,
                             o_ref, pad1_ref, pad2_ref, *, H):
    # pair_ref : (2, H, W*Cinp)            f32   [x_i ; y_i] row slabs
    # wt1_ref  : (3*W*Cinp, W*C1)          bf16  K-concatenated banded conv-1
    # b1_ref   : (1, W*C1)                 f32   conv-1 bias tiled over W
    # wt2_ref  : (3*W*C1,   W*C2)          bf16  K-concatenated banded conv-2
    # b2_ref   : (1, W*C2)                 f32   conv-2 bias tiled over W
    # o_ref    : (1, 1, W*C2)              f32   per-lane partial sums of d^2
    # pad1_ref : (2, H+2, W*Cinp)          f32   VMEM scratch (v-padded L1 in)
    # pad2_ref : (2, H+2, W*C1)            f32   VMEM scratch (v-padded L2 in)
    P = pair_ref.shape[0]  # 2: the x image and the y image of this pair

    def conv3x3_relu(pad_ref, act, wt_ref, b_ref):
        # act: (P, H, Lin) f32.  Vertical pad=1 via the scratch buffer; the
        # horizontal taps + padding live in the banded weight; the 3 vertical
        # taps are folded into K, so the whole conv is one MXU matmul.
        lin = act.shape[-1]
        zrow = jnp.zeros((P, 1, lin), jnp.float32)
        pad_ref[:, 0:1, :] = zrow                # top zero border
        pad_ref[:, H + 1:H + 2, :] = zrow        # bottom zero border
        pad_ref[:, 1:H + 1, :] = act             # interior rows
        # Three shifted H-row windows, lane-concatenated -> (P*H, 3*Lin).
        lhs = jnp.concatenate(
            [pad_ref[:, kh:kh + H, :] for kh in range(3)],
            axis=-1).reshape(P * H, 3 * lin)
        out = jnp.dot(lhs.astype(jnp.bfloat16), wt_ref[...],
                      preferred_element_type=jnp.float32)
        return jnp.maximum(out + b_ref[...], 0.0)  # (P*H, Lout) f32

    h1 = conv3x3_relu(pad1_ref, pair_ref[...], wt1_ref, b1_ref)
    h2 = conv3x3_relu(pad2_ref, h1.reshape(P, H, -1), wt2_ref, b2_ref)

    lout = h2.shape[-1]
    feats = h2.reshape(P, H, lout)
    d = feats[0] - feats[1]                       # (H, W*C2) f32
    # Lane-dense per-step partial sums (reduce over rows only); the wrapper
    # finishes the reduction and applies the 1/count normalization.
    o_ref[...] = jnp.sum(d * d, axis=0, keepdims=True).reshape(1, 1, lout)


# ----------------------------------------------------------------------------
# Frozen-weight preprocessing (done once, outside the hot path).
# ----------------------------------------------------------------------------
def _banded_conv_weights(w, width):
    """(3, 3, Cin, Cout) conv kernel -> (3, width*Cin, width*Cout) banded mats.

    For each vertical tap kh:
      Wt[kh][wi*Cin + ci, wo*Cout + co] = w[kh, wi - wo + 1, ci, co]
    when |wi - wo| <= 1, else 0 -- the horizontal 3-tap convolution with zero
    padding becomes a matmul over the lane-flattened (w, c) axis.
    """
    kh, kw, cin, cout = w.shape
    wi = jnp.arange(width)[:, None]
    wo = jnp.arange(width)[None, :]
    tap = wi - wo + 1
    valid = ((tap >= 0) & (tap <= kw - 1)).astype(w.dtype)
    t = w[:, jnp.clip(tap, 0, kw - 1)]               # (3, W, W, Cin, Cout)
    t = t * valid[None, :, :, None, None]
    t = jnp.transpose(t, (0, 1, 3, 2, 4))            # (3, W, Cin, W, Cout)
    return t.reshape(kh, width * cin, width * cout)


def init_encoder_params(key, cin=4, c1=16, c2=32):
    k1, k2, k3, k4 = jax.random.split(key, 4)
    return {
        "w1": jax.random.normal(k1, (3, 3, cin, c1), jnp.float32) * 0.1,
        "b1": jax.random.normal(k2, (c1,), jnp.float32) * 0.01,
        "w2": jax.random.normal(k3, (3, 3, c1, c2), jnp.float32) * 0.1,
        "b2": jax.random.normal(k4, (c2,), jnp.float32) * 0.01,
    }


def prepare_encoder(params, width):
    """Build the frozen, kernel-ready encoder weights once.

    Returns bf16 K-concatenated banded conv matrices and W-tiled f32 biases.
    The input-channel count of layer 1 is zero-padded so W*Cin is a multiple
    of 128 (full-lane layer-1 loads and MXU K).
    """
    params = jax.tree_util.tree_map(jax.lax.stop_gradient, params)  # frozen
    cin = params["w1"].shape[2]
    c1 = params["w1"].shape[3]
    lane_mult = 128 // math.gcd(width, 128)
    cinp = ((cin + lane_mult - 1) // lane_mult) * lane_mult
    w1p = jnp.pad(params["w1"], ((0, 0), (0, 0), (0, cinp - cin), (0, 0)))

    wt1 = _banded_conv_weights(w1p, width)
    wt1 = wt1.reshape(3 * width * cinp, -1).astype(jnp.bfloat16)
    wt2 = _banded_conv_weights(params["w2"], width)
    wt2 = wt2.reshape(3 * width * c1, -1).astype(jnp.bfloat16)
    b1t = jnp.tile(params["b1"], width).reshape(1, -1).astype(jnp.float32)
    b2t = jnp.tile(params["b2"], width).reshape(1, -1).astype(jnp.float32)
    return {"wt1": wt1, "b1": b1t, "wt2": wt2, "b2": b2t}


# ----------------------------------------------------------------------------
# Wrapper: layout plumbing + pallas_call.
# ----------------------------------------------------------------------------
def perceptual_loss(prepped, x_nchw, y_nchw):
    """MSE between frozen-encoder features of x and y (NCHW inputs)."""
    wt1, b1t = prepped["wt1"], prepped["b1"]
    wt2, b2t = prepped["wt2"], prepped["b2"]

    N, Cin, H, W = x_nchw.shape
    cinp = wt1.shape[0] // (3 * W)
    c1 = wt1.shape[1] // W
    c2 = wt2.shape[1] // W

    # NCHW -> NHWC -> channel-pad to cinp -> lane-flattened (N, H, W*cinp).
    def to_slab(t):
        t = jnp.transpose(t, (0, 2, 3, 1)).astype(jnp.float32)
        t = jnp.pad(t, ((0, 0), (0, 0), (0, 0), (0, cinp - Cin)))
        return t.reshape(N, H, W * cinp)

    # Interleave x_i / y_i so each grid step gets one pair stacked along M.
    pairs = jnp.stack([to_slab(x_nchw), to_slab(y_nchw)], axis=1)
    pairs = pairs.reshape(2 * N, H, W * cinp)

    kernel = functools.partial(_fused_perceptual_kernel, H=H)

    out = pl.pallas_call(
        kernel,
        out_shape=jax.ShapeDtypeStruct((N, 1, W * c2), jnp.float32),
        grid=(N,),
        in_specs=[
            pl.BlockSpec((2, H, W * cinp), lambda i: (i, 0, 0)),
            pl.BlockSpec((3 * W * cinp, W * c1), lambda i: (0, 0)),
            pl.BlockSpec((1, W * c1), lambda i: (0, 0)),
            pl.BlockSpec((3 * W * c1, W * c2), lambda i: (0, 0)),
            pl.BlockSpec((1, W * c2), lambda i: (0, 0)),
        ],
        out_specs=pl.BlockSpec((1, 1, W * c2), lambda i: (i, 0, 0)),
        scratch_shapes=[
            pltpu.VMEM((2, H + 2, W * cinp), jnp.float32),
            pltpu.VMEM((2, H + 2, W * c1), jnp.float32),
        ],
        compiler_params=pltpu.CompilerParams(
            dimension_semantics=("parallel",),
            vmem_limit_bytes=32 * 1024 * 1024),
    )(pairs, wt1, b1t, wt2, b2t)

    return jnp.sum(out) / float(N * H * W * c2)


# ----------------------------------------------------------------------------
# Pure-JAX reference (f32) for a numerical sanity check.
# ----------------------------------------------------------------------------
def _reference_loss(params, x_nchw, y_nchw):
    def enc(t):
        h = jnp.transpose(t, (0, 2, 3, 1)).astype(jnp.float32)
        for wk, bk in (("w1", "b1"), ("w2", "b2")):
            h = jax.lax.conv_general_dilated(
                h, params[wk], window_strides=(1, 1), padding="SAME",
                dimension_numbers=("NHWC", "HWIO", "NHWC"))
            h = jnp.maximum(h + params[bk], 0.0)
        return h

    d = enc(x_nchw) - enc(y_nchw)
    return jnp.mean(d * d)


if __name__ == "__main__":
    key = jax.random.PRNGKey(0)
    kp, kx, ky = jax.random.split(key, 3)

    params = init_encoder_params(kp)

    # Small NCHW inputs matching the PyTorch module's image interface.
    x = jax.random.normal(kx, (2, 4, 16, 16), jnp.float32)
    y = jax.random.normal(ky, (2, 4, 16, 16), jnp.float32)

    # Frozen-weight preprocessing happens ONCE, outside the jitted hot path.
    prepped = prepare_encoder(params, width=16)
    prepped = jax.tree_util.tree_map(jax.block_until_ready, prepped)

    loss_fn = jax.jit(functools.partial(perceptual_loss, prepped))
    loss = loss_fn(x, y)
    jax.block_until_ready(loss)

    # Sanity: finite scalar.
    assert loss.shape == ()
    assert bool(jnp.isfinite(loss))

    # Numerical sanity vs. pure-JAX f32 reference (kernel uses bf16 MXU
    # operands, so allow a loose relative tolerance).
    ref = jax.jit(_reference_loss)(params, x, y)
    jax.block_until_ready(ref)
    rel = abs(float(loss) - float(ref)) / max(abs(float(ref)), 1e-6)
    assert rel < 5e-2, f"loss mismatch: pallas={float(loss)} ref={float(ref)}"

    print("KERNEL_OK")
</pallas_src>

<mosaic_0001>
module attributes {stable_mosaic.version = 11 : i64} {
  func.func @_fused_perceptual_kernel(%arg0: i32, %arg1: memref<2x16x128xf32, #tpu.memory_space<vmem>>, %arg2: memref<384x256xbf16, #tpu.memory_space<vmem>>, %arg3: memref<1x256xf32, #tpu.memory_space<vmem>>, %arg4: memref<768x512xbf16, #tpu.memory_space<vmem>>, %arg5: memref<1x512xf32, #tpu.memory_space<vmem>>, %arg6: memref<1x1x512xf32, #tpu.memory_space<vmem>>, %arg7: memref<2x18x128xf32, #tpu.memory_space<vmem>>, %arg8: memref<2x18x256xf32, #tpu.memory_space<vmem>>) attributes {dimension_semantics = [#tpu.dimension_semantics<parallel>], iteration_bounds = array<i64: 2>, scalar_prefetch = 0 : i64, scratch_operands = 2 : i64, tpu.core_type = #tpu.core_type<tc>, window_params = [{transform_indices = @transform_0, window_bounds = array<i64: 2, 16, 128>}, {pipeline_mode = #tpu.pipeline_mode<synchronous>, transform_indices = @transform_1, window_bounds = array<i64: 384, 256>}, {pipeline_mode = #tpu.pipeline_mode<synchronous>, transform_indices = @transform_2, window_bounds = array<i64: 1, 256>}, {pipeline_mode = #tpu.pipeline_mode<synchronous>, transform_indices = @transform_3, window_bounds = array<i64: 768, 512>}, {pipeline_mode = #tpu.pipeline_mode<synchronous>, transform_indices = @transform_4, window_bounds = array<i64: 1, 512>}, {transform_indices = @transform_5, window_bounds = array<i64: 1, 1, 512>}]} {
    %c0 = arith.constant 0 : index
    %c0_0 = arith.constant 0 : index
    %c0_1 = arith.constant 0 : index
    %0 = vector.load %arg1[%c0, %c0_0, %c0_1] : memref<2x16x128xf32, #tpu.memory_space<vmem>>, vector<2x16x128xf32>
    %cst = arith.constant 0.000000e+00 : f32
    %1 = vector.broadcast %cst : f32 to vector<2x1x128xf32>
    %c0_2 = arith.constant 0 : index
    %c0_3 = arith.constant 0 : index
    %c0_4 = arith.constant 0 : index
    %2 = vector.load %arg7[%c0_2, %c0_3, %c0_4] : memref<2x18x128xf32, #tpu.memory_space<vmem>>, vector<2x1x128xf32>
    tpu.vector_store %arg7[%c0_2, %c0_3, %c0_4], %1 {strides = array<i32>} : memref<2x18x128xf32, #tpu.memory_space<vmem>>, vector<2x1x128xf32>,
    %c0_5 = arith.constant 0 : index
    %c17 = arith.constant 17 : index
    %c0_6 = arith.constant 0 : index
    %3 = vector.load %arg7[%c0_5, %c17, %c0_6] : memref<2x18x128xf32, #tpu.memory_space<vmem>>, vector<2x1x128xf32>
    tpu.vector_store %arg7[%c0_5, %c17, %c0_6], %1 {strides = array<i32>} : memref<2x18x128xf32, #tpu.memory_space<vmem>>, vector<2x1x128xf32>,
    %c0_7 = arith.constant 0 : index
    %c1 = arith.constant 1 : index
    %c0_8 = arith.constant 0 : index
    %4 = vector.load %arg7[%c0_7, %c1, %c0_8] : memref<2x18x128xf32, #tpu.memory_space<vmem>>, vector<2x16x128xf32>
    tpu.vector_store %arg7[%c0_7, %c1, %c0_8], %0 {strides = array<i32>} : memref<2x18x128xf32, #tpu.memory_space<vmem>>, vector<2x16x128xf32>,
    %c0_9 = arith.constant 0 : index
    %c0_10 = arith.constant 0 : index
    %c0_11 = arith.constant 0 : index
    %5 = vector.load %arg7[%c0_9, %c0_10, %c0_11] : memref<2x18x128xf32, #tpu.memory_space<vmem>>, vector<2x16x128xf32>
    %c0_12 = arith.constant 0 : index
    %c1_13 = arith.constant 1 : index
    %c0_14 = arith.constant 0 : index
    %6 = vector.load %arg7[%c0_12, %c1_13, %c0_14] : memref<2x18x128xf32, #tpu.memory_space<vmem>>, vector<2x16x128xf32>
    %c0_15 = arith.constant 0 : index
    %c2 = arith.constant 2 : index
    %c0_16 = arith.constant 0 : index
    %7 = vector.load %arg7[%c0_15, %c2, %c0_16] : memref<2x18x128xf32, #tpu.memory_space<vmem>>, vector<2x16x128xf32>
    %8 = tpu.concatenate %5, %6, %7 in 2 : vector<2x16x128xf32>, vector<2x16x128xf32>, vector<2x16x128xf32> -> vector<2x16x384xf32>
    %9 = vector.shape_cast %8 : vector<2x16x384xf32> to vector<32x384xf32>
    %10 = arith.truncf %9 : vector<32x384xf32> to vector<32x384xbf16>
    %c0_17 = arith.constant 0 : index
    %c0_18 = arith.constant 0 : index
    %11 = vector.load %arg2[%c0_17, %c0_18] : memref<384x256xbf16, #tpu.memory_space<vmem>>, vector<384x256xbf16>
    %cst_19 = arith.constant dense<0.000000e+00> : vector<32x256xf32>
    %12 = tpu.matmul %10, %11, %cst_19 {dimension_numbers = #tpu.dot_dimension_numbers<[1], [0], [0], [1], [0, 0, 1, 1], [], []>} : vector<32x384xbf16>, vector<384x256xbf16>, vector<32x256xf32> -> vector<32x256xf32>
    %c0_20 = arith.constant 0 : index
    %c0_21 = arith.constant 0 : index
    %13 = vector.load %arg3[%c0_20, %c0_21] : memref<1x256xf32, #tpu.memory_space<vmem>>, vector<1x256xf32>
    %14 = vector.broadcast %13 : vector<1x256xf32> to vector<32x256xf32>
    %15 = arith.addf %12, %14 : vector<32x256xf32>
    %cst_22 = arith.constant 0.000000e+00 : f32
    %16 = vector.broadcast %cst_22 : f32 to vector<32x256xf32>
    %17 = arith.maximumf %15, %16 : vector<32x256xf32>
    %18 = vector.shape_cast %17 : vector<32x256xf32> to vector<2x16x256xf32>
    %cst_23 = arith.constant 0.000000e+00 : f32
    %19 = vector.broadcast %cst_23 : f32 to vector<2x1x256xf32>
    %c0_24 = arith.constant 0 : index
    %c0_25 = arith.constant 0 : index
    %c0_26 = arith.constant 0 : index
    %20 = vector.load %arg8[%c0_24, %c0_25, %c0_26] : memref<2x18x256xf32, #tpu.memory_space<vmem>>, vector<2x1x256xf32>
    tpu.vector_store %arg8[%c0_24, %c0_25, %c0_26], %19 {strides = array<i32>} : memref<2x18x256xf32, #tpu.memory_space<vmem>>, vector<2x1x256xf32>,
    %c0_27 = arith.constant 0 : index
    %c17_28 = arith.constant 17 : index
    %c0_29 = arith.constant 0 : index
    %21 = vector.load %arg8[%c0_27, %c17_28, %c0_29] : memref<2x18x256xf32, #tpu.memory_space<vmem>>, vector<2x1x256xf32>
    tpu.vector_store %arg8[%c0_27, %c17_28, %c0_29], %19 {strides = array<i32>} : memref<2x18x256xf32, #tpu.memory_space<vmem>>, vector<2x1x256xf32>,
    %c0_30 = arith.constant 0 : index
    %c1_31 = arith.constant 1 : index
    %c0_32 = arith.constant 0 : index
    %22 = vector.load %arg8[%c0_30, %c1_31, %c0_32] : memref<2x18x256xf32, #tpu.memory_space<vmem>>, vector<2x16x256xf32>
    tpu.vector_store %arg8[%c0_30, %c1_31, %c0_32], %18 {strides = array<i32>} : memref<2x18x256xf32, #tpu.memory_space<vmem>>, vector<2x16x256xf32>,
    %c0_33 = arith.constant 0 : index
    %c0_34 = arith.constant 0 : index
    %c0_35 = arith.constant 0 : index
    %23 = vector.load %arg8[%c0_33, %c0_34, %c0_35] : memref<2x18x256xf32, #tpu.memory_space<vmem>>, vector<2x16x256xf32>
    %c0_36 = arith.constant 0 : index
    %c1_37 = arith.constant 1 : index
    %c0_38 = arith.constant 0 : index
    %24 = vector.load %arg8[%c0_36, %c1_37, %c0_38] : memref<2x18x256xf32, #tpu.memory_space<vmem>>, vector<2x16x256xf32>
    %c0_39 = arith.constant 0 : index
    %c2_40 = arith.constant 2 : index
    %c0_41 = arith.constant 0 : index
    %25 = vector.load %arg8[%c0_39, %c2_40, %c0_41] : memref<2x18x256xf32, #tpu.memory_space<vmem>>, vector<2x16x256xf32>
    %26 = tpu.concatenate %23, %24, %25 in 2 : vector<2x16x256xf32>, vector<2x16x256xf32>, vector<2x16x256xf32> -> vector<2x16x768xf32>
    %27 = vector.shape_cast %26 : vector<2x16x768xf32> to vector<32x768xf32>
    %28 = arith.truncf %27 : vector<32x768xf32> to vector<32x768xbf16>
    %c0_42 = arith.constant 0 : index
    %c0_43 = arith.constant 0 : index
    %29 = vector.load %arg4[%c0_42, %c0_43] : memref<768x512xbf16, #tpu.memory_space<vmem>>, vector<768x512xbf16>
    %cst_44 = arith.constant dense<0.000000e+00> : vector<32x512xf32>
    %30 = tpu.matmul %28, %29, %cst_44 {dimension_numbers = #tpu.dot_dimension_numbers<[1], [0], [0], [1], [0, 0, 1, 1], [], []>} : vector<32x768xbf16>, vector<768x512xbf16>, vector<32x512xf32> -> vector<32x512xf32>
    %c0_45 = arith.constant 0 : index
    %c0_46 = arith.constant 0 : index
    %31 = vector.load %arg5[%c0_45, %c0_46] : memref<1x512xf32, #tpu.memory_space<vmem>>, vector<1x512xf32>
    %32 = vector.broadcast %31 : vector<1x512xf32> to vector<32x512xf32>
    %33 = arith.addf %30, %32 : vector<32x512xf32>
    %cst_47 = arith.constant 0.000000e+00 : f32
    %34 = vector.broadcast %cst_47 : f32 to vector<32x512xf32>
    %35 = arith.maximumf %33, %34 : vector<32x512xf32>
    %36 = vector.shape_cast %35 : vector<32x512xf32> to vector<2x16x512xf32>
    %37 = vector.extract_strided_slice %36 {offsets = [0, 0, 0], sizes = [1, 16, 512], strides = [1, 1, 1]} : vector<2x16x512xf32> to vector<1x16x512xf32>
    %38 = vector.shape_cast %37 : vector<1x16x512xf32> to vector<16x512xf32>
    %39 = vector.extract_strided_slice %36 {offsets = [1, 0, 0], sizes = [1, 16, 512], strides = [1, 1, 1]} : vector<2x16x512xf32> to vector<1x16x512xf32>
    %40 = vector.shape_cast %39 : vector<1x16x512xf32> to vector<16x512xf32>
    %41 = arith.subf %38, %40 : vector<16x512xf32>
    %42 = arith.mulf %41, %41 : vector<16x512xf32>
    %cst_48 = arith.constant dense<0.000000e+00> : vector<512xf32>
    %43 = vector.multi_reduction <add>, %42, %cst_48 [0] : vector<16x512xf32> to vector<512xf32>
    %44 = vector.shape_cast %43 : vector<512xf32> to vector<1x512xf32>
    %45 = vector.shape_cast %44 : vector<1x512xf32> to vector<1x1x512xf32>
    %c0_49 = arith.constant 0 : index
    %c0_50 = arith.constant 0 : index
    %c0_51 = arith.constant 0 : index
    %46 = vector.load %arg6[%c0_49, %c0_50, %c0_51] : memref<1x1x512xf32, #tpu.memory_space<vmem>>, vector<1x1x512xf32>
    tpu.vector_store %arg6[%c0_49, %c0_50, %c0_51], %45 {strides = array<i32>} : memref<1x1x512xf32, #tpu.memory_space<vmem>>, vector<1x1x512xf32>,
    return
  }
  func.func @transform_0(%arg0: i32) -> (i32, i32, i32) {
    %c0_i32 = arith.constant 0 : i32
    %c0_i32_0 = arith.constant 0 : i32
    %c0_i32_1 = arith.constant 0 : i32
    return %arg0, %c0_i32, %c0_i32_0 : i32, i32, i32
  }
  func.func @transform_1(%arg0: i32) -> (i32, i32) {
    %c0_i32 = arith.constant 0 : i32
    %c0_i32_0 = arith.constant 0 : i32
    %c0_i32_1 = arith.constant 0 : i32
    return %c0_i32, %c0_i32_0 : i32, i32
  }
  func.func @transform_2(%arg0: i32) -> (i32, i32) {
    %c0_i32 = arith.constant 0 : i32
    %c0_i32_0 = arith.constant 0 : i32
    %c0_i32_1 = arith.constant 0 : i32
    return %c0_i32, %c0_i32_0 : i32, i32
  }
  func.func @transform_3(%arg0: i32) -> (i32, i32) {
    %c0_i32 = arith.constant 0 : i32
    %c0_i32_0 = arith.constant 0 : i32
    %c0_i32_1 = arith.constant 0 : i32
    return %c0_i32, %c0_i32_0 : i32, i32
  }
  func.func @transform_4(%arg0: i32) -> (i32, i32) {
    %c0_i32 = arith.constant 0 : i32
    %c0_i32_0 = arith.constant 0 : i32
    %c0_i32_1 = arith.constant 0 : i32
    return %c0_i32, %c0_i32_0 : i32, i32
  }
  func.func @transform_5(%arg0: i32) -> (i32, i32, i32) {
    %c0_i32 = arith.constant 0 : i32
    %c0_i32_0 = arith.constant 0 : i32
    %c0_i32_1 = arith.constant 0 : i32
    return %arg0, %c0_i32, %c0_i32_0 : i32, i32, i32
  }
}

</mosaic_0001>

<bundles_post_ra>
// kernel: perceptual_loss.1
= control target key start
LH: loop header
LB: loop body
LE: loop exit
PB: predicated region body
PF: predicated region fallthrough
CT: control target
= control target key end

     0   :  { %10 = vsyncpa [#allocation5], 0  ;;  %s3952_s18 = smov 0   ;;  %s4543_s0 = inlined_call_operand.vmem [shape: f32[4,16,128], index: 0, kind: input, shape index: {}]   ;;  %s4544_s1 = inlined_call_operand.vmem [shape: bf16[384,256], index: 1, kind: input, shape index: {}]   ;;  %s4545_s2 = inlined_call_operand.vmem [shape: f32[1,256], index: 2, kind: input, shape index: {}]   ;;  %s4546_s3 = inlined_call_operand.hbm [shape: bf16[768,512], index: 3, kind: input, shape index: {}]   ;;  %s4547_s4 = inlined_call_operand.vmem [shape: f32[1,512], index: 4, kind: input, shape index: {}]   ;;  %s4548_s5 = inlined_call_operand.vmem [shape: f32[2,1,512], index: 5, kind: output, shape index: {}]  }
   0x1 LB: > { %s174_s21 = sshll.u32 %s4546_s3, 4  ;;  %s3961_s22 = sadd.s32 4294967295, %s3916_s18   ;;  %s3916_s18 = sphi %s3952_s18, %s16_s18   ;;  %s175_s21 = int_to_ptr.hbm [resolvable:$true] %s174_s21 }
   0x2   : > { %p2626_p0 = scmp.ge.s32.totalorder %s3916_s18, 1  ;;  %p157_p1 = scmp.lt.s32.totalorder %s3916_s18, 3 }
   0x3   : > { %p3862_p2 = scmp.eq.s32.totalorder %s3961_s22, 0  ;;  %s3918_s23 = smov [#allocation4]  }
   0x4   : > { %p158_p3 = pnand %p2626_p0, %p157_p1  ;;  %s176_s24 = sshll.u32 %s3918_s23, 4  ;;  %s177_s24 = int_to_ptr.vmem [resolvable:$true] %s176_s24 }
   0x5   : > { %s3919_s25 = smov 256   ;;  %s3920_s26 = smov 16  }
   0x6   : > { %p3858_p4 = pneg %p158_p3  ;;  %205 = sbr.rel (%p158_p3) target bundleno = 583 (0x247), region = 40 }
   0x8   : > { %p3859_p5 = pnand %p3862_p2, %p3858_p4 }
   0xa   : > { %3861 = dma.hbm_to_vmem [thread:$0]  (!%p3859_p5), %s175_s21, 24576, %s177_s24, [#allocation5], %s3919_s25, %s3919_s25, %s3920_s26  }
   0xb   : > { %3911 = dma.done.wait (%p3862_p2), [#allocation5], 24576  }
   0xc   : > { %3913 = vsyncadd (%p3862_p2), [#allocation5], 4294942720  ;;  %v3921_v0 = vmov 0.0   ;;  %s2631_s27 = sshll.u32 %s3961_s22, 1  ;;  %v2693_v1 = vld [vmem:[%s4544_s1 + $0x70] sm:$0xf] }
   0xd   : > { %249 = vst [vmem:[#allocation2] sm:$0x1] %v3921_v0  ;;  %p3973_p6 = scmp.lt.s32.totalorder %s2631_s27, 3  ;;  %v3613_v2 = vld [vmem:[%s4544_s1 + $0x74] sm:$0xf0]  ;;  %vm714_vm1 = vcmask 1040384  }
   0xe   : > { %250 = vst [vmem:[#allocation2 + $0x18] sm:$0x1] %v3921_v0  ;;  %v2757_v3 = vld [vmem:[%s4544_s1 + $0xf0] sm:$0xf]  ;;  %v2694_v4 = vor.u32 %v3613_v2, %v2693_v1  ;;  %v3629_v5 = vld [vmem:[%s4544_s1 + $0xf4] sm:$0xf0] }
   0xf   : > { %251 = vst [vmem:[#allocation2 + $0x11] sm:$0x1] %v3921_v0  ;;  %v2821_v6 = vld [vmem:[%s4544_s1 + $0x170] sm:$0xf]  ;;  %v3645_v7 = vld [vmem:[%s4544_s1 + $0x174] sm:$0xf0]  ;;  %v2758_v8 = vor.u32 %v3629_v5, %v2757_v3 }
  0x10   : > { %252 = vst [vmem:[#allocation2 + $0x29] sm:$0x1] %v3921_v0  ;;  %v2822_v9 = vor.u32 %v3645_v7, %v2821_v6  ;;  %v2685_v10 = vld [vmem:[%s4544_s1 + $0x60] sm:$0xf]  ;;  %v3611_v11 = vld [vmem:[%s4544_s1 + $0x64] sm:$0xf0]  ;;  %569 = vmatpush.bf16.msra.mxu0 %v2694_v4 }
  0x11   : > { %v2749_v12 = vld [vmem:[%s4544_s1 + $0xe0] sm:$0xf]  ;;  %v2686_v13 = vor.u32 %v3611_v11, %v2685_v10  ;;  %v3627_v14 = vld [vmem:[%s4544_s1 + $0xe4] sm:$0xf0]  ;;  %588 = vmatpush.bf16.msra.mxu1 %v2758_v8  ;;  %v2677_v19 = vld [vmem:[%s4544_s1 + $0x50] sm:$0xf] }
  0x12   : > { %v2813_v15 = vld [vmem:[%s4544_s1 + $0x160] sm:$0xf]  ;;  %v3643_v16 = vld [vmem:[%s4544_s1 + $0x164] sm:$0xf0]  ;;  %607 = vmatpush.bf16.msra.mxu2 %v2822_v9  ;;  %v2750_v17 = vor.u32 %v3627_v14, %v2749_v12  ;;  %v3609_v20 = vld [vmem:[%s4544_s1 + $0x54] sm:$0xf0] }
  0x13   : > { %v2814_v18 = vor.u32 %v3643_v16, %v2813_v15  ;;  %v2741_v21 = vld [vmem:[%s4544_s1 + $0xd0] sm:$0xf]  ;;  %v3625_v22 = vld [vmem:[%s4544_s1 + $0xd4] sm:$0xf0]  ;;  %v2678_v25 = vor.u32 %v3609_v20, %v2677_v19  ;;  %s4553_s27 = smov (!%p3973_p6, %s2631_s27), 3  ;;  %vm787_vm2 = vcmask 1046528  }
  0x14   : > { %v2805_v23 = vld [vmem:[%s4544_s1 + $0x150] sm:$0xf]  ;;  %v3641_v24 = vld [vmem:[%s4544_s1 + $0x154] sm:$0xf0]  ;;  %570 = vmatpush.bf16.msra.mxu0 %v2686_v13  ;;  %v2742_v26 = vor.u32 %v3625_v22, %v2741_v21  ;;  %v2669_v28 = vld [vmem:[%s4544_s1 + $0x40] sm:$0xf] }
  0x15   : > { %589 = vmatpush.bf16.msra.mxu1 %v2750_v17  ;;  %v2806_v27 = vor.u32 %v3641_v24, %v2805_v23  ;;  %v3607_v29 = vld [vmem:[%s4544_s1 + $0x44] sm:$0xf0]  ;;  %v2733_v30 = vld [vmem:[%s4544_s1 + $0xc0] sm:$0xf]  ;;  %v3612_v34 = vld [vmem:[%s4544_s1 + $0x74] sm:$0xf] }
  0x16   : > { %608 = vmatpush.bf16.msra.mxu2 %v2814_v18  ;;  %v3623_v31 = vld [vmem:[%s4544_s1 + $0xc4] sm:$0xf0]  ;;  %v2797_v32 = vld [vmem:[%s4544_s1 + $0x140] sm:$0xf]  ;;  %v2695_v35 = vld [vmem:[%s4544_s1 + $0x78] sm:$0xf0]  ;;  %v2670_v36 = vor.u32 %v3607_v29, %v2669_v28 }
  0x17   : > { %v3639_v33 = vld [vmem:[%s4544_s1 + $0x144] sm:$0xf0]  ;;  %v2661_v37 = vld [vmem:[%s4544_s1 + $0x30] sm:$0xf]  ;;  %v3605_v38 = vld [vmem:[%s4544_s1 + $0x34] sm:$0xf0]  ;;  %v2698_v39 = vor.u32 %v3612_v34, %v2695_v35  ;;  %v2734_v40 = vor.u32 %v3623_v31, %v2733_v30 }
  0x18   : > { %571 = vmatpush.bf16.msra.mxu0 %v2678_v25  ;;  %s3597_s17 = sshll.u32 %s4553_s27, 4  ;;  %v2798_v41 = vor.u32 %v3639_v33, %v2797_v32  ;;  %v2725_v42 = vld [vmem:[%s4544_s1 + $0xb0] sm:$0xf]  ;;  %v3621_v43 = vld [vmem:[%s4544_s1 + $0xb4] sm:$0xf0]  ;;  %v2662_v49 = vor.u32 %v3605_v38, %v2661_v37  ;;  %vm824_vm3 = vcmask 1045504  }
  0x19   : > { %590 = vmatpush.bf16.msra.mxu1 %v2742_v26  ;;  %v3610_v44 = vld [vmem:[%s4544_s1 + $0x64] sm:$0xf]  ;;  %v2789_v45 = vld [vmem:[%s4544_s1 + $0x130] sm:$0xf]  ;;  %v3637_v46 = vld [vmem:[%s4544_s1 + $0x134] sm:$0xf0]  ;;  %626 = vmatpush.bf16.msra.mxu3 %v2698_v39  ;;  %s4095_s13 = scalar_lea.vmem %s4543_s0, %s3597_s17  ;;  %v2726_v52 = vor.u32 %v3621_v43, %v2725_v42 }
  0x1a   : > { %609 = vmatpush.bf16.msra.mxu2 %v2806_v27  ;;  %v2687_v47 = vld [vmem:[%s4544_s1 + $0x68] sm:$0xf0]  ;;  %v3608_v50 = vld [vmem:[%s4544_s1 + $0x54] sm:$0xf]  ;;  %v2679_v51 = vld [vmem:[%s4544_s1 + $0x58] sm:$0xf0]  ;;  %v2790_v53 = vor.u32 %v3637_v46, %v2789_v45 }
  0x1b   : > { %v2690_v48 = vor.u32 %v3610_v44, %v2687_v47  ;;  %v2653_v54 = vld [vmem:[%s4544_s1 + $0x20] sm:$0xf]  ;;  %v3603_v55 = vld [vmem:[%s4544_s1 + $0x24] sm:$0xf0]  ;;  %v2682_v60 = vor.u32 %v3608_v50, %v2679_v51  ;;  %v3606_v61 = vld [vmem:[%s4544_s1 + $0x44] sm:$0xf] }
  0x1c   : > { %572 = vmatpush.bf16.msra.mxu0 %v2670_v36  ;;  %v2717_v56 = vld [vmem:[%s4544_s1 + $0xa0] sm:$0xf]  ;;  %v3619_v57 = vld [vmem:[%s4544_s1 + $0xa4] sm:$0xf0]  ;;  %v2671_v62 = vld [vmem:[%s4544_s1 + $0x48] sm:$0xf0]  ;;  %v2654_v1 = vor.u32 %v3603_v55, %v2653_v54 }
  0x1d   : > { %591 = vmatpush.bf16.msra.mxu1 %v2734_v40  ;;  %v2781_v58 = vld [vmem:[%s4544_s1 + $0x120] sm:$0xf]  ;;  %v3635_v59 = vld [vmem:[%s4544_s1 + $0x124] sm:$0xf0]  ;;  %627 = vmatpush.bf16.msra.mxu3 %v2690_v48  ;;  %v2645_v2 = vld [vmem:[%s4544_s1 + $0x10] sm:$0xf]  ;;  %v2718_v4 = vor.u32 %v3619_v57, %v2717_v56  ;;  %v2674_v11 = vor.u32 %v3606_v61, %v2671_v62 }
  0x1e   : > { %610 = vmatpush.bf16.msra.mxu2 %v2798_v41  ;;  %v4122_v63 = vld [vmem:[%s4095_s13] sm:$0xff]  ;;  %v246_v3 = vld [vmem:[%s4095_s13 + $0x8] sm:$0xff]  ;;  %v2782_v5 = vor.u32 %v3635_v59, %v2781_v58  ;;  %v3601_v6 = vld [vmem:[%s4544_s1 + $0x14] sm:$0xf0]  ;;  %p241_p7 = scmp.lt.s32.totalorder %s3961_s22, 1  ;;  %vm2551_vm4 = vcmask 1042434  }
  0x1f   : > { %253 = vst [vmem:[#allocation2 + $0x1] sm:$0xff] %v4122_v63  ;;  %v2709_v7 = vld [vmem:[%s4544_s1 + $0x90] sm:$0xf]  ;;  %v3617_v8 = vld [vmem:[%s4544_s1 + $0x94] sm:$0xf0]  ;;  %v2646_v15 = vor.u32 %v3601_v6, %v2645_v2  ;;  %v4204_v47 = vpack.c.bf16 %v246_v3, %v4122_v63  ;;  %vm2553_vm5 = vcmask 1041408  }
  0x20   : > { %573 = vmatpush.bf16.msra.mxu0 %v2662_v49  ;;  %254 = vst [vmem:[#allocation2 + $0x9] sm:$0xff] %v246_v3  ;;  %v2773_v9 = vld [vmem:[%s4544_s1 + $0x110] sm:$0xf]  ;;  %v3633_v10 = vld [vmem:[%s4544_s1 + $0x114] sm:$0xf0]  ;;  %v2710_v19 = vor.u32 %v3617_v8, %v2709_v7  ;;  %s4555_s22 = smov (!%p241_p7, %s3961_s22), 1 }
  0x21   : > { %592 = vmatpush.bf16.msra.mxu1 %v2726_v52  ;;  %628 = vmatpush.bf16.msra.mxu3 %v2682_v60  ;;  %v2637_v12 = vld [vmem:[%s4544_s1] sm:$0xf]  ;;  %v3604_v13 = vld [vmem:[%s4544_s1 + $0x34] sm:$0xf]  ;;  %v2663_v14 = vld [vmem:[%s4544_s1 + $0x38] sm:$0xf0]  ;;  %v2774_v20 = vor.u32 %v3633_v10, %v2773_v9 }
  0x22   : > { %611 = vmatpush.bf16.msra.mxu2 %v2790_v53  ;;  %v3599_v16 = vld [vmem:[%s4544_s1 + $0x4] sm:$0xf0]  ;;  %v2701_v17 = vld [vmem:[%s4544_s1 + $0x80] sm:$0xf]  ;;  %v4160_v18 = vld [vmem:[%s4095_s13 + $0x10] sm:$0xff]  ;;  %v2666_v26 = vor.u32 %v3604_v13, %v2663_v14  ;;  %s2634_s28 = sshll.u32 %s4555_s22, 2 }
  0x23   : > { %v3615_v21 = vld [vmem:[%s4544_s1 + $0x84] sm:$0xf0]  ;;  %v2765_v22 = vld [vmem:[%s4544_s1 + $0x100] sm:$0xf]  ;;  %v3628_v24 = vld [vmem:[%s4544_s1 + $0xf4] sm:$0xf]  ;;  %v2638_v30 = vor.u32 %v3599_v16, %v2637_v12  ;;  %s244_s30 = scalar_lea.vmem %s4548_s5, %s2634_s28 }
  0x24   : > { %574 = vmatpush.bf16.msra.mxu0 %v2654_v1  ;;  %v3631_v23 = vld [vmem:[%s4544_s1 + $0x104] sm:$0xf0]  ;;  %v2759_v25 = vld [vmem:[%s4544_s1 + $0xf8] sm:$0xf0]  ;;  %v3644_v27 = vld [vmem:[%s4544_s1 + $0x174] sm:$0xf]  ;;  %v2702_v34 = vor.u32 %v3615_v21, %v2701_v17 }
  0x25   : > { %593 = vmatpush.bf16.msra.mxu1 %v2718_v4  ;;  %629 = vmatpush.bf16.msra.mxu3 %v2674_v11  ;;  %v2823_v28 = vld [vmem:[%s4544_s1 + $0x178] sm:$0xf0]  ;;  %v3602_v29 = vld [vmem:[%s4544_s1 + $0x24] sm:$0xf]  ;;  %255 = vst [vmem:[#allocation2 + $0x19] sm:$0xff] %v4160_v18  ;;  %v2766_v35 = vor.u32 %v3631_v23, %v2765_v22  ;;  %v2762_v38 = vor.u32 %v3628_v24, %v2759_v25 }
  0x26   : > { %612 = vmatpush.bf16.msra.mxu2 %v2782_v5  ;;  %v257_v31 = vld [vmem:[#allocation2] sm:$0xff]  ;;  %v2655_v33 = vld [vmem:[%s4544_s1 + $0x28] sm:$0xf0]  ;;  %v2826_v39 = vor.u32 %v3644_v27, %v2823_v28  ;;  %v248_v42 = vld [vmem:[%s4095_s13 + $0x18] sm:$0xff] }
  0x27   : > { %v258_v32 = vld [vmem:[#allocation2 + $0x8] sm:$0xff]  ;;  %v3626_v40 = vld [vmem:[%s4544_s1 + $0xe4] sm:$0xf]  ;;  %v2658_v44 = vor.u32 %v3602_v29, %v2655_v33  ;;  %256 = vst [vmem:[#allocation2 + $0x21] sm:$0xff] %v248_v42  ;;  %v3600_v49 = vld [vmem:[%s4544_s1 + $0x14] sm:$0xf]  ;;  %v273_v22 = vpack.c.bf16 %v248_v42, %v4160_v18 }
  0x28   : > { %575 = vmatpush.bf16.msra.mxu0 %v2646_v15  ;;  %v265_v36 = vld [vmem:[#allocation2 + $0x2] sm:$0xff]  ;;  %v266_v37 = vld [vmem:[#allocation2 + $0xa] sm:$0xff]  ;;  %v269_v43 = vpack.c.bf16 %v258_v32, %v257_v31  ;;  %v2647_v50 = vld [vmem:[%s4544_s1 + $0x18] sm:$0xf0] }
  0x29   : > { %594 = vmatpush.bf16.msra.mxu1 %v2710_v19  ;;  %630 = vmatpush.bf16.msra.mxu3 %v2666_v26  ;;  %v2751_v41 = vld [vmem:[%s4544_s1 + $0xe8] sm:$0xf0]  ;;  %v3642_v45 = vld [vmem:[%s4544_s1 + $0x164] sm:$0xf]  ;;  %v4206_v48 = vpack.c.bf16 %v266_v37, %v265_v36  ;;  %v3624_v53 = vld [vmem:[%s4544_s1 + $0xd4] sm:$0xf]  ;;  %v2650_v55 = vor.u32 %v3600_v49, %v2647_v50 }
  0x2a   : > { %613 = vmatpush.bf16.msra.mxu2 %v2774_v20  ;;  %v2815_v46 = vld [vmem:[%s4544_s1 + $0x168] sm:$0xf0]  ;;  %v2754_v51 = vor.u32 %v3626_v40, %v2751_v41  ;;  %v2743_v54 = vld [vmem:[%s4544_s1 + $0xd8] sm:$0xf0]  ;;  %v3640_v56 = vld [vmem:[%s4544_s1 + $0x154] sm:$0xf] }
  0x2b   : > { %v2818_v52 = vor.u32 %v3642_v45, %v2815_v46  ;;  %v2807_v57 = vld [vmem:[%s4544_s1 + $0x158] sm:$0xf0]  ;;  %v3598_v58 = vld [vmem:[%s4544_s1 + $0x4] sm:$0xf]  ;;  %v2639_v59 = vld [vmem:[%s4544_s1 + $0x8] sm:$0xf0]  ;;  %v2746_v60 = vor.u32 %v3624_v53, %v2743_v54 }
  0x2c   : > { %576 = vmatpush.bf16.msra.mxu0 %v2638_v30  ;;  %v2810_v61 = vor.u32 %v3640_v56, %v2807_v57  ;;  %v3622_v62 = vld [vmem:[%s4544_s1 + $0xc4] sm:$0xf]  ;;  %v2735_v63 = vld [vmem:[%s4544_s1 + $0xc8] sm:$0xf0]  ;;  %v2642_v1 = vor.u32 %v3598_v58, %v2639_v59  ;;  %v3620_v6 = vld [vmem:[%s4544_s1 + $0xb4] sm:$0xf] }
  0x2d   : > { %595 = vmatpush.bf16.msra.mxu1 %v2702_v34  ;;  %631 = vmatpush.bf16.msra.mxu3 %v2658_v44  ;;  %v3638_v2 = vld [vmem:[%s4544_s1 + $0x144] sm:$0xf]  ;;  %v2799_v3 = vld [vmem:[%s4544_s1 + $0x148] sm:$0xf0]  ;;  %v2738_v4 = vor.u32 %v3622_v62, %v2735_v63  ;;  %v2727_v7 = vld [vmem:[%s4544_s1 + $0xb8] sm:$0xf0]  ;;  %v691_v63 = vlaneseq }
  0x2e   : > { %614 = vmatpush.bf16.msra.mxu2 %v2766_v35  ;;  %v2802_v5 = vor.u32 %v3638_v2, %v2799_v3  ;;  %v3636_v8 = vld [vmem:[%s4544_s1 + $0x134] sm:$0xf]  ;;  %v2791_v9 = vld [vmem:[%s4544_s1 + $0x138] sm:$0xf0]  ;;  %v260_v11 = vld [vmem:[#allocation2 + $0x20] sm:$0xff]  ;;  %v2730_v14 = vor.u32 %v3620_v6, %v2727_v7 }
  0x2f   : > { %577 = vmatmul.bf16.vlgmr.msra.gmra.mxu0 %v269_v43  ;;  %v259_v10 = vld [vmem:[#allocation2 + $0x18] sm:$0xff]  ;;  %v268_v13 = vld [vmem:[#allocation2 + $0x22] sm:$0xff]  ;;  %v2794_v15 = vor.u32 %v3636_v8, %v2791_v9  ;;  %v2719_v19 = vld [vmem:[%s4544_s1 + $0xa8] sm:$0xf0]  ;;  %vm4298_vm0 = vcmp.lt.s32.totalorder %v691_v63, 256  ;;  %vm2556_vm6 = vcmp.lt.s32.totalorder %v691_v63, 512 }
  0x30   : > { %645 = vmatpush.bf16.msrb.mxu0 %v2762_v38  ;;  %596 = vmatmul.bf16.vlgmr.msra.gmra.mxu1 %v4204_v47  ;;  %v267_v12 = vld [vmem:[#allocation2 + $0x1a] sm:$0xff]  ;;  %v3618_v16 = vld [vmem:[%s4544_s1 + $0xa4] sm:$0xf]  ;;  %v272_v17 = vpack.c.bf16 %v260_v11, %v259_v10  ;;  %v2783_v21 = vld [vmem:[%s4544_s1 + $0x128] sm:$0xf0] }
  0x31   : > { %664 = vmatpush.bf16.msrb.mxu1 %v2826_v39  ;;  %615 = vmatmul.bf16.vlgmr.msra.gmra.mxu2 %v4206_v48  ;;  %v3634_v20 = vld [vmem:[%s4544_s1 + $0x124] sm:$0xf]  ;;  %v274_v23 = vpack.c.bf16 %v268_v13, %v267_v12  ;;  %v2722_v24 = vor.u32 %v3618_v16, %v2719_v19  ;;  %v3616_v26 = vld [vmem:[%s4544_s1 + $0x94] sm:$0xf]  ;;  %v2711_v27 = vld [vmem:[%s4544_s1 + $0x98] sm:$0xf0] }
  0x32   : > { %632 = vmatpush.bf16.msra.mxu3 %v2650_v55  ;;  %v2786_v25 = vor.u32 %v3634_v20, %v2783_v21  ;;  %v3632_v28 = vld [vmem:[%s4544_s1 + $0x114] sm:$0xf]  ;;  %v2775_v18 = vld [vmem:[%s4544_s1 + $0x118] sm:$0xf0]  ;;  %v2714_v29 = vor.u32 %v3616_v26, %v2711_v27  ;;  %v3614_v31 = vld [vmem:[%s4544_s1 + $0x84] sm:$0xf] }
  0x33   : > { %v2778_v30 = vor.u32 %v3632_v28, %v2775_v18  ;;  %v2703_v32 = vld [vmem:[%s4544_s1 + $0x88] sm:$0xf0]  ;;  %v3630_v33 = vld [vmem:[%s4544_s1 + $0x104] sm:$0xf]  ;;  %v2941_v37 = vld [vmem:[#allocation4 + $0xe0] sm:$0xf] }
  0x34   : > { %646 = vmatpush.bf16.msrb.mxu0 %v2754_v51  ;;  %v2767_v34 = vld [vmem:[%s4544_s1 + $0x108] sm:$0xf0]  ;;  %v2706_v35 = vor.u32 %v3614_v31, %v2703_v32  ;;  %v3676_v38 = vld [vmem:[#allocation4 + $0xec] sm:$0xf0]  ;;  %v2925_v40 = vld [vmem:[#allocation4 + $0xc0] sm:$0xf] }
  0x35   : > { %665 = vmatpush.bf16.msrb.mxu1 %v2818_v52  ;;  %v2770_v36 = vor.u32 %v3630_v33, %v2767_v34  ;;  %v2942_v39 = vor.u32 %v3676_v38, %v2941_v37  ;;  %v3672_v41 = vld [vmem:[#allocation4 + $0xcc] sm:$0xf0]  ;;  %v3197_v46 = vld [vmem:[#allocation4 + $0x2e0] sm:$0xf] }
  0x36   : > { %633 = vmatpush.bf16.msra.mxu3 %v2642_v1  ;;  %v2926_v42 = vor.u32 %v3672_v41, %v2925_v40  ;;  %v3668_v44 = vld [vmem:[#allocation4 + $0xac] sm:$0xf0]  ;;  %v3181_v52 = vld [vmem:[#allocation4 + $0x2c0] sm:$0xf] }
  0x37   : > { %2027 = vmatpush.bf16.msrb.mxu2 %v2942_v39  ;;  %v3740_v49 = vld [vmem:[#allocation4 + $0x2ec] sm:$0xf0]  ;;  %v2877_v55 = vld [vmem:[#allocation4 + $0x60] sm:$0xf] }
  0x38   : > { %647 = vmatpush.bf16.msrb.mxu0 %v2746_v60  ;;  %v3198_v50 = vor.u32 %v3740_v49, %v3197_v46  ;;  %v3664_v51 = vld [vmem:[#allocation4 + $0x8c] sm:$0xf0]  ;;  %v3165_v58 = vld [vmem:[#allocation4 + $0x2a0] sm:$0xf] }
  0x39   : > { %666 = vmatpush.bf16.msrb.mxu1 %v2810_v61  ;;  %634 = vmatmul.bf16.vlgmr.msra.gmra.mxu3 %v269_v43  ;;  %v2909_v43 = vld [vmem:[#allocation4 + $0xa0] sm:$0xf]  ;;  %v3736_v53 = vld [vmem:[#allocation4 + $0x2cc] sm:$0xf0] }
  0x3a   : > { %v2910_v45 = vor.u32 %v3668_v44, %v2909_v43  ;;  %v3182_v54 = vor.u32 %v3736_v53, %v3181_v52  ;;  %v3660_v56 = vld [vmem:[#allocation4 + $0x6c] sm:$0xf0]  ;;  %v2861_v61 = vld [vmem:[#allocation4 + $0x40] sm:$0xf]  ;;  %v3674_v52 = vld [vmem:[#allocation4 + $0xe4] sm:$0xf] }
  0x3b   : > { %2028 = vmatpush.bf16.msrb.mxu2 %v2926_v42  ;;  %v2878_v57 = vor.u32 %v3660_v56, %v2877_v55  ;;  %v3732_v59 = vld [vmem:[#allocation4 + $0x2ac] sm:$0xf0]  ;;  %v3149_v2 = vld [vmem:[#allocation4 + $0x280] sm:$0xf]  ;;  %v2943_v56 = vld [vmem:[#allocation4 + $0xf0] sm:$0xf0] }
  0x3c   : > { %648 = vmatpush.bf16.msrb.mxu0 %v2738_v4  ;;  %v3166_v60 = vor.u32 %v3732_v59, %v3165_v58  ;;  %v3656_v62 = vld [vmem:[#allocation4 + $0x4c] sm:$0xf0]  ;;  %695 = vst.msk [vmem:[#allocation3] ss:$8 sm:$0x3] %vm4298_vm0, %v3921_v0 }
  0x3d   : > { %667 = vmatpush.bf16.msrb.mxu1 %v2802_v5  ;;  %v2862_v1 = vor.u32 %v3656_v62, %v2861_v61  ;;  %v3728_v3 = vld [vmem:[#allocation4 + $0x28c] sm:$0xf0]  ;;  %v2845_v6 = vld [vmem:[#allocation4 + $0x20] sm:$0xf] }
  0x3e   : > { %v3150_v5 = vor.u32 %v3728_v3, %v3149_v2  ;;  %v3652_v7 = vld [vmem:[#allocation4 + $0x2c] sm:$0xf0]  ;;  %698 = vst.msk [vmem:[#allocation3 + $0x30] ss:$8 sm:$0x3] %vm4298_vm0, %v3921_v0 }
  0x3f   : > { %582 = vmatmul.bf16.gmra.mxu0 %v272_v17  ;;  %2029 = vmatpush.bf16.msrb.mxu2 %v2910_v45  ;;  %v2846_v8 = vor.u32 %v3652_v7, %v2845_v6  ;;  %v3133_v9 = vld [vmem:[#allocation4 + $0x260] sm:$0xf]  ;;  %v3724_v10 = vld [vmem:[#allocation4 + $0x26c] sm:$0xf0]  ;;  %v3670_v3 = vld [vmem:[#allocation4 + $0xc4] sm:$0xf] }
  0x40   : > { %649 = vmatpush.bf16.msrb.mxu0 %v2730_v14  ;;  %601 = vmatmul.bf16.gmra.mxu1 %v273_v22  ;;  %v3134_v11 = vor.u32 %v3724_v10, %v3133_v9  ;;  %701 = vst.msk [vmem:[#allocation3 + $0x21] ss:$8 sm:$0x3] %vm4298_vm0, %v3921_v0  ;;  %v3069_v12 = vld [vmem:[#allocation4 + $0x1e0] sm:$0xf] }
  0x41   : > { %668 = vmatpush.bf16.msrb.mxu1 %v2794_v15  ;;  %620 = vmatmul.bf16.gmra.mxu2 %v274_v23  ;;  %v3708_v13 = vld [vmem:[#allocation4 + $0x1ec] sm:$0xf0]  ;;  %v2829_v14 = vld [vmem:[#allocation4] sm:$0xf]  ;;  %v2927_v7 = vld [vmem:[#allocation4 + $0xd0] sm:$0xf0] }
  0x42   : > { %v3070_v15 = vor.u32 %v3708_v13, %v3069_v12  ;;  %v3648_v16 = vld [vmem:[#allocation4 + $0xc] sm:$0xf0]  ;;  %704 = vst.msk [vmem:[#allocation3 + $0x51] ss:$8 sm:$0x3] %vm4298_vm0, %v3921_v0  ;;  %v2930_v9 = vor.u32 %v3670_v3, %v2927_v7 }
  0x43   : > { %v3720_v19 = vld [vmem:[#allocation4 + $0x24c] sm:$0xf0]  ;;  %v2830_v20 = vor.u32 %v3648_v16, %v2829_v14  ;;  %v3101_v27 = vld [vmem:[#allocation4 + $0x220] sm:$0xf] }
  0x44   : > { %650 = vmatpush.bf16.msrb.mxu0 %v2722_v24  ;;  %2046 = vmatpush.bf16.msrb.mxu3 %v3070_v15  ;;  %v3453_v24 = vld [vmem:[#allocation4 + $0x4e0] sm:$0xf]  ;;  %v3804_v26 = vld [vmem:[#allocation4 + $0x4ec] sm:$0xf0] }
  0x45   : > { %669 = vmatpush.bf16.msrb.mxu1 %v2786_v25  ;;  %v3716_v28 = vld [vmem:[#allocation4 + $0x22c] sm:$0xf0]  ;;  %v3454_v18 = vor.u32 %v3804_v26, %v3453_v24  ;;  %v3437_v32 = vld [vmem:[#allocation4 + $0x4c0] sm:$0xf]  ;;  %v2911_v26 = vld [vmem:[#allocation4 + $0xb0] sm:$0xf0] }
  0x46   : > { %v3102_v0 = vor.u32 %v3716_v28, %v3101_v27  ;;  %v3700_v31 = vld [vmem:[#allocation4 + $0x1ac] sm:$0xf0]  ;;  %v3325_v37 = vld [vmem:[#allocation4 + $0x3e0] sm:$0xf] }
  0x47   : > { %v3800_v34 = vld [vmem:[#allocation4 + $0x4cc] sm:$0xf0]  ;;  %v3021_v43 = vld [vmem:[#allocation4 + $0x180] sm:$0xf] }
  0x48   : > { %651 = vmatpush.bf16.msrb.mxu0 %v2714_v29  ;;  %v4317_v29 = vld [vmem:[%s4545_s2] sm:$0x3]  ;;  %v3438_v38 = vor.u32 %v3800_v34, %v3437_v32  ;;  %v3421_v45 = vld [vmem:[#allocation4 + $0x4a0] sm:$0xf] }
  0x49   : > { %670 = vmatpush.bf16.msrb.mxu1 %v2778_v30  ;;  %639 = vmatmul.bf16.gmra.mxu3 %v272_v17  ;;  %v3117_v17 = vld [vmem:[#allocation4 + $0x240] sm:$0xf]  ;;  %v4320_v39 = vperm.slane %v4317_v29, 0  ;;  %v3772_v41 = vld [vmem:[#allocation4 + $0x3ec] sm:$0xf0] }
  0x4a   : > { %v3118_v21 = vor.u32 %v3720_v19, %v3117_v17  ;;  %v3037_v30 = vld [vmem:[#allocation4 + $0x1a0] sm:$0xf]  ;;  %v3326_v42 = vor.u32 %v3772_v41, %v3325_v37  ;;  %v3696_v44 = vld [vmem:[#allocation4 + $0x18c] sm:$0xf0] }
  0x4b   : > { %v3038_v33 = vor.u32 %v3700_v31, %v3037_v30  ;;  %v3022_v49 = vor.u32 %v3696_v44, %v3021_v43  ;;  %v3005_v58 = vld [vmem:[#allocation4 + $0x160] sm:$0xf]  ;;  %v3692_v59 = vld [vmem:[#allocation4 + $0x16c] sm:$0xf0] }
  0x4c   : > { %652 = vmatpush.bf16.msrb.mxu0 %v2706_v35  ;;  %v3085_v35 = vld [vmem:[#allocation4 + $0x200] sm:$0xf]  ;;  %v3006_v61 = vor.u32 %v3692_v59, %v3005_v58  ;;  %v3792_v62 = vld [vmem:[#allocation4 + $0x48c] sm:$0xf0]  ;;  %v2879_v58 = vld [vmem:[#allocation4 + $0x70] sm:$0xf0] }
  0x4d   : > { %671 = vmatpush.bf16.msrb.mxu1 %v2770_v36  ;;  %v3712_v36 = vld [vmem:[#allocation4 + $0x20c] sm:$0xf0]  ;;  %v2989_v10 = vld [vmem:[#allocation4 + $0x140] sm:$0xf] }
  0x4e   : > { %v3086_v40 = vor.u32 %v3712_v36, %v3085_v35  ;;  %v3764_v2 = vld [vmem:[#allocation4 + $0x3ac] sm:$0xf0]  ;;  %v3389_v12 = vld [vmem:[#allocation4 + $0x460] sm:$0xf]  ;;  %v3662_v35 = vld [vmem:[#allocation4 + $0x84] sm:$0xf] }
  0x4f   : > { %653 = vmatmul.bf16.vlgmr.msrb.gmra.mxu0 %v4204_v47  ;;  %v2893_v47 = vld [vmem:[#allocation4 + $0x80] sm:$0xf]  ;;  %v3788_v16 = vld [vmem:[#allocation4 + $0x46c] sm:$0xf0] }
  0x50   : > { %672 = vmatmul.bf16.vlgmr.msrb.gmra.mxu1 %v4206_v48  ;;  %2065 = vmatpush.bf16.msra.mxu0 %v3198_v50  ;;  %v2894_v48 = vor.u32 %v3664_v51, %v2893_v47  ;;  %v3796_v50 = vld [vmem:[#allocation4 + $0x4ac] sm:$0xf0]  ;;  %v3309_v51 = vld [vmem:[#allocation4 + $0x3c0] sm:$0xf] }
  0x51   : > { %2084 = vmatpush.bf16.msra.mxu1 %v3326_v42  ;;  %v3422_v53 = vor.u32 %v3796_v50, %v3421_v45  ;;  %v3277_v19 = vld [vmem:[#allocation4 + $0x380] sm:$0xf]  ;;  %v3784_v32 = vld [vmem:[#allocation4 + $0x44c] sm:$0xf0] }
  0x52   : > { %2030 = vmatpush.bf16.msrb.mxu2 %v2894_v48  ;;  %v3768_v48 = vld [vmem:[#allocation4 + $0x3cc] sm:$0xf0]  ;;  %v2973_v28 = vld [vmem:[#allocation4 + $0x120] sm:$0xf] }
  0x53   : > { %v3310_v55 = vor.u32 %v3768_v48, %v3309_v51  ;;  %v3756_v34 = vld [vmem:[#allocation4 + $0x36c] sm:$0xf0]  ;;  %v2957_v43 = vld [vmem:[#allocation4 + $0x100] sm:$0xf] }
  0x54   : > { %2066 = vmatpush.bf16.msra.mxu0 %v3182_v54  ;;  %v3680_v44 = vld [vmem:[#allocation4 + $0x10c] sm:$0xf0]  ;;  %v3357_v45 = vld [vmem:[#allocation4 + $0x420] sm:$0xf] }
  0x55   : > { %2085 = vmatpush.bf16.msra.mxu1 %v3310_v55  ;;  %v2958_v50 = vor.u32 %v3680_v44, %v2957_v43  ;;  %v3245_v48 = vld [vmem:[#allocation4 + $0x340] sm:$0xf]  ;;  %v3776_v3 = vld [vmem:[#allocation4 + $0x40c] sm:$0xf0] }
  0x56   : > { %2031 = vmatpush.bf16.msrb.mxu2 %v2878_v57  ;;  %v2946_v57 = vor.u32 %v3674_v52, %v2943_v56  ;;  %v3752_v52 = vld [vmem:[#allocation4 + $0x34c] sm:$0xf0]  ;;  %v3549_v44 = vld [vmem:[#allocation4 + $0x5a0] sm:$0xf] }
  0x58   : > { %2067 = vmatpush.bf16.msra.mxu0 %v3166_v60  ;;  %v3405_v60 = vld [vmem:[#allocation4 + $0x480] sm:$0xf] }
  0x59   : > { %v3406_v4 = vor.u32 %v3792_v62, %v3405_v60  ;;  %v3581_v60 = vld [vmem:[#allocation4 + $0x5e0] sm:$0xf] }
  0x5a   : > { %2032 = vmatpush.bf16.msrb.mxu2 %v2862_v1  ;;  %v3293_v1 = vld [vmem:[#allocation4 + $0x3a0] sm:$0xf] }
  0x5b   : > { %v3294_v6 = vor.u32 %v3764_v2, %v3293_v1  ;;  %v3341_v62 = vld [vmem:[#allocation4 + $0x400] sm:$0xf] }
  0x5c   : > { %2068 = vmatpush.bf16.msra.mxu0 %v3150_v5  ;;  %v3342_v7 = vor.u32 %v3776_v3, %v3341_v62  ;;  %v3071_v62 = vld [vmem:[#allocation4 + $0x1f0] sm:$0xf0]  ;;  %v3702_v3 = vld [vmem:[#allocation4 + $0x1c4] sm:$0xf] }
  0x5d   : > { %2086 = vmatpush.bf16.msra.mxu1 %v3294_v6  ;;  %v3229_v6 = vld [vmem:[#allocation4 + $0x320] sm:$0xf] }
  0x5e   : > { %2033 = vmatpush.bf16.msrb.mxu2 %v2846_v8 }
  0x5f   : > { %658 = vmatmul.bf16.gmra.mxu0 %v273_v22  ;;  %v3053_v22 = vld [vmem:[#allocation4 + $0x1c0] sm:$0xf] }
  0x60   : > { %677 = vmatmul.bf16.gmra.mxu1 %v274_v23  ;;  %2069 = vmatpush.bf16.msra.mxu0 %v3134_v11  ;;  %v3704_v23 = vld [vmem:[#allocation4 + $0x1cc] sm:$0xf0] }
  0x61   : > { %v3054_v25 = vor.u32 %v3704_v23, %v3053_v22  ;;  %v3688_v11 = vld [vmem:[#allocation4 + $0x14c] sm:$0xf0]  ;;  %v3390_v22 = vor.u32 %v3788_v16, %v3389_v12  ;;  %v4332_v16 = vperm.slane %v4317_v29, 1  ;;  %v3565_v29 = vld [vmem:[#allocation4 + $0x5c0] sm:$0xf] }
  0x62   : > { %2034 = vmatpush.bf16.msrb.mxu2 %v2830_v20  ;;  %v2990_v15 = vor.u32 %v3688_v11, %v2989_v10  ;;  %v3760_v20 = vld [vmem:[#allocation4 + $0x38c] sm:$0xf0] }
  0x63   : > { %2047 = vmatpush.bf16.msrb.mxu3 %v3054_v25  ;;  %v3278_v25 = vor.u32 %v3760_v20, %v3277_v19  ;;  %v3748_v10 = vld [vmem:[#allocation4 + $0x32c] sm:$0xf0]  ;;  %v2863_v20 = vld [vmem:[#allocation4 + $0x50] sm:$0xf0] }
  0x64   : > { %2070 = vmatpush.bf16.msra.mxu0 %v3118_v21  ;;  %v3666_v21 = vld [vmem:[#allocation4 + $0xa4] sm:$0xf] }
  0x65   : > { %v2914_v27 = vor.u32 %v3666_v21, %v2911_v26  ;;  %2087 = vmatpush.bf16.msra.mxu1 %v3278_v25  ;;  %v3650_v25 = vld [vmem:[#allocation4 + $0x24] sm:$0xf] }
  0x66   : > { %2103 = vmatpush.bf16.msra.mxu2 %v3454_v18  ;;  %v3684_v18 = vld [vmem:[#allocation4 + $0x12c] sm:$0xf0] }
  0x67   : > { %2048 = vmatpush.bf16.msrb.mxu3 %v3038_v33  ;;  %v2974_v31 = vor.u32 %v3684_v18, %v2973_v28  ;;  %v3261_v33 = vld [vmem:[#allocation4 + $0x360] sm:$0xf]  ;;  %v2847_v18 = vld [vmem:[#allocation4 + $0x30] sm:$0xf0] }
  0x68   : > { %2071 = vmatpush.bf16.msra.mxu0 %v3102_v0  ;;  %v3373_v0 = vld [vmem:[#allocation4 + $0x440] sm:$0xf] }
  0x69   : > { %v3374_v36 = vor.u32 %v3784_v32, %v3373_v0  ;;  %v2850_v0 = vor.u32 %v3650_v25, %v2847_v18  ;;  %v3039_v25 = vld [vmem:[#allocation4 + $0x1b0] sm:$0xf0]  ;;  %v3730_v18 = vld [vmem:[#allocation4 + $0x2a4] sm:$0xf] }
  0x6a   : > { %2104 = vmatpush.bf16.msra.mxu2 %v3438_v38  ;;  %v3262_v38 = vor.u32 %v3756_v34, %v3261_v33 }
  0x6b   : > { %2049 = vmatpush.bf16.msrb.mxu3 %v3022_v49 }
  0x6c   : > { %2072 = vmatpush.bf16.msra.mxu0 %v3086_v40  ;;  %v2895_v40 = vld [vmem:[#allocation4 + $0x90] sm:$0xf0]  ;;  %2088 = vmatpush.bf16.msra.mxu1 %v3262_v38 }
  0x6d   : > { %v2898_v42 = vor.u32 %v3662_v35, %v2895_v40 }
  0x6e   : > { %2105 = vmatpush.bf16.msra.mxu2 %v3422_v53  ;;  %v3658_v53 = vld [vmem:[#allocation4 + $0x64] sm:$0xf] }
  0x6f   : > { %2050 = vmatpush.bf16.msrb.mxu3 %v3006_v61  ;;  %v2882_v59 = vor.u32 %v3658_v53, %v2879_v58  ;;  %v3836_v61 = vld [vmem:[#allocation4 + $0x5ec] sm:$0xf0]  ;;  %v3706_v58 = vld [vmem:[#allocation4 + $0x1e4] sm:$0xf] }
  0x70   : > { %2141 = vmatpush.bf16.msrb.mxu0 %v2946_v57  ;;  %v3246_v57 = vor.u32 %v3752_v52, %v3245_v48  ;;  %v3582_v2 = vor.u32 %v3836_v61, %v3581_v60  ;;  %v3183_v52 = vld [vmem:[#allocation4 + $0x2d0] sm:$0xf0] }
  0x72   : > { %2106 = vmatpush.bf16.msra.mxu2 %v3406_v4  ;;  %2089 = vmatpush.bf16.msra.mxu1 %v3246_v57  ;;  %v2831_v57 = vld [vmem:[#allocation4 + $0x10] sm:$0xf0] }
  0x73   : > { %2051 = vmatpush.bf16.msrb.mxu3 %v2990_v15 }
  0x74   : > { %2142 = vmatpush.bf16.msrb.mxu0 %v2930_v9 }
  0x76   : > { %2107 = vmatpush.bf16.msra.mxu2 %v3390_v22 }
  0x77   : > { %2052 = vmatpush.bf16.msrb.mxu3 %v2974_v31  ;;  %v3738_v31 = vld [vmem:[#allocation4 + $0x2e4] sm:$0xf] }
  0x78   : > { %2143 = vmatpush.bf16.msrb.mxu0 %v2914_v27 }
  0x7a   : > { %2108 = vmatpush.bf16.msra.mxu2 %v3374_v36  ;;  %v3199_v36 = vld [vmem:[#allocation4 + $0x2f0] sm:$0xf0] }
  0x7b   : > { %2053 = vmatpush.bf16.msrb.mxu3 %v2958_v50  ;;  %v3202_v40 = vor.u32 %v3738_v31, %v3199_v36  ;;  %v3820_v36 = vld [vmem:[#allocation4 + $0x56c] sm:$0xf0] }
  0x7c   : > { %2144 = vmatpush.bf16.msrb.mxu0 %v2898_v42 }
  0x7f   : > { %2122 = vmatpush.bf16.msra.mxu3 %v3582_v2  ;;  %v3074_v2 = vor.u32 %v3706_v58, %v3071_v62  ;;  %v3816_v58 = vld [vmem:[#allocation4 + $0x54c] sm:$0xf0]  ;;  %v3690_v62 = vld [vmem:[#allocation4 + $0x164] sm:$0xf] }
  0x80   : > { %2145 = vmatpush.bf16.msrb.mxu0 %v2882_v59 }
  0xac   : > { %v578_v46 = vpop.f32.mrf.mxu0 }
  0xad   : > { %v597_v47 = vpop.f32.mrf.mxu1  ;;  %v579_v54 = vadd.f32 %v578_v46, %v4320_v39 }
  0xaf   : > { %v598_v5 = vadd.f32 %v597_v47, %v579_v54  ;;  %v3780_v47 = vld [vmem:[#allocation4 + $0x42c] sm:$0xf0] }
  0xb0   : > { %v3358_v54 = vor.u32 %v3780_v47, %v3357_v45  ;;  %v3828_v45 = vld [vmem:[#allocation4 + $0x5ac] sm:$0xf0] }
  0xb1   : > { %v3550_v48 = vor.u32 %v3828_v45, %v3549_v44 }
  0xb2   : > { %2109 = vmatpush.bf16.msra.mxu2 %v3358_v54 }
  0xb4   : > { %v616_v8 = vpop.f32.mrf.mxu2  ;;  %v580_v14 = vpop.f32.mrf.mxu0 }
  0xb5   : > { %v617_v13 = vadd.f32 %v616_v8, %v598_v5  ;;  %v599_v17 = vpop.f32.mrf.mxu1  ;;  %v581_v24 = vadd.f32 %v580_v14, %v4320_v39  ;;  %v3654_v14 = vld [vmem:[#allocation4 + $0x44] sm:$0xf] }
  0xb6   : > { %2110 = vmatpush.bf16.msra.mxu2 %v3342_v7  ;;  %v2866_v22 = vor.u32 %v3654_v14, %v2863_v20  ;;  %v3455_v7 = vld [vmem:[#allocation4 + $0x4f0] sm:$0xf0]  ;;  %v3698_v20 = vld [vmem:[#allocation4 + $0x1a4] sm:$0xf] }
  0xb7   : > { %v683_v23 = vmax.f32 %v617_v13, 0.0  ;;  %v600_v37 = vadd.f32 %v599_v17, %v581_v24  ;;  %v3230_v13 = vor.u32 %v3748_v10, %v3229_v6  ;;  %v3744_v24 = vld [vmem:[#allocation4 + $0x30c] sm:$0xf0]  ;;  %v3042_v31 = vor.u32 %v3698_v20, %v3039_v25 }
  0xb8   : > { %2146 = vmatpush.bf16.msrb.mxu0 %v2866_v22 }
  0xb9   : > { %v715_v30 = vrot.slane %v683_v23, 7  ;;  %2090 = vmatpush.bf16.msra.mxu1 %v3230_v13  ;;  %v3213_v23 = vld [vmem:[#allocation4 + $0x300] sm:$0xf] }
  0xba   : > { %v3214_v28 = vor.u32 %v3744_v24, %v3213_v23 }
  0xbb   : > { %739 = vst [vmem:[#allocation3] sm:$0xfe] %v715_v30 }
  0xbc   : > { %v618_v41 = vpop.f32.mrf.mxu2  ;;  %v583_v49 = vpop.f32.mrf.mxu0  ;;  %2147 = vmatpush.bf16.msrb.mxu0 %v2850_v0 }
  0xbd   : > { %v619_v46 = vadd.f32 %v618_v41, %v600_v37  ;;  %v602_v51 = vpop.f32.mrf.mxu1  ;;  %v584_v56 = vadd.f32 %v583_v49, %v4320_v39  ;;  %v635_v4 = vpop.f32.mrf.mxu3  ;;  %2091 = vmatpush.bf16.msra.mxu1 %v3214_v28  ;;  %v3439_v28 = vld [vmem:[#allocation4 + $0x4d0] sm:$0xf0] }
  0xbe   : > { %v636_v37 = vadd.f32 %v635_v4, %v4332_v16  ;;  %v3055_v4 = vld [vmem:[#allocation4 + $0x1d0] sm:$0xf0] }
  0xbf   : > { %v685_v55 = vmax.f32 %v619_v46, 0.0  ;;  %v603_v9 = vadd.f32 %v602_v51, %v584_v56  ;;  %v3734_v46 = vld [vmem:[#allocation4 + $0x2c4] sm:$0xf]  ;;  %v3058_v13 = vor.u32 %v3702_v3, %v3055_v4 }
  0xc0   : > { %v3646_v56 = vld [vmem:[#allocation4 + $0x4] sm:$0xf]  ;;  %v3186_v59 = vor.u32 %v3734_v46, %v3183_v52 }
  0xc1   : > { %v717_v1 = vrot.slane %v685_v55, 7  ;;  %v2834_v61 = vor.u32 %v3646_v56, %v2831_v57  ;;  %2160 = vmatpush.bf16.msrb.mxu1 %v3074_v2  ;;  %v3501_v57 = vld [vmem:[#allocation4 + $0x540] sm:$0xf] }
  0xc2   : > { %v751_v5 = vld [vmem:[#allocation3] sm:$0xff] }
  0xc3   : > { %v4326_v8 = vsel %vm714_vm1, %v715_v30, %v717_v1  ;;  %743 = vst [vmem:[#allocation3 + $0x20] sm:$0x1] %v717_v1  ;;  %v759_v19 = vld [vmem:[#allocation3] sm:$0xfe]  ;;  %v3832_v30 = vld [vmem:[#allocation4 + $0x5cc] sm:$0xf0]  ;;  %2148 = vmatpush.bf16.msrb.mxu0 %v2834_v61  ;;  %v3502_v61 = vor.u32 %v3816_v58, %v3501_v57 }
  0xc4   : > { %v621_v11 = vpop.f32.mrf.mxu2  ;;  %v4329_v12 = vpack.c.bf16 %v4326_v8, %v751_v5  ;;  %v585_v17 = vpop.f32.mrf.mxu0  ;;  %v789_v33 = vrot.slane %v4326_v8, 1  ;;  %v788_v34 = vrot.slane %v759_v19, 1  ;;  %v3566_v35 = vor.u32 %v3832_v30, %v3565_v29  ;;  %v3802_v5 = vld [vmem:[#allocation4 + $0x4e4] sm:$0xf] }
  0xc5   : > { %v622_v15 = vadd.f32 %v621_v11, %v603_v9  ;;  %v604_v21 = vpop.f32.mrf.mxu1  ;;  %v586_v27 = vadd.f32 %v585_v17, %v4320_v39  ;;  %v637_v43 = vpop.f32.mrf.mxu3  ;;  %v3533_v9 = vld [vmem:[#allocation4 + $0x580] sm:$0xf]  ;;  %v3458_v14 = vor.u32 %v3802_v5, %v3455_v7  ;;  %2161 = vmatpush.bf16.msrb.mxu1 %v3058_v13  ;;  %v826_v2 = vrot.slane %v4326_v8, 2  ;;  %v3407_v8 = vld [vmem:[#allocation4 + $0x490] sm:$0xf0] }
  0xc6   : > { %2035 = vmatmul.bf16.vlgmr.msrb.gmra.mxu2 %v4329_v12  ;;  %2123 = vmatpush.bf16.msra.mxu3 %v3566_v35  ;;  %v790_v47 = vsel %vm787_vm2, %v788_v34, %v789_v33  ;;  %v3517_v34 = vld [vmem:[#allocation4 + $0x560] sm:$0xf]  ;;  %v3714_v58 = vld [vmem:[#allocation4 + $0x224] sm:$0xf] }
  0xc7   : > { %v687_v26 = vmax.f32 %v622_v15, 0.0  ;;  %v605_v39 = vadd.f32 %v604_v21, %v586_v27  ;;  %2179 = vmatpush.bf16.msrb.mxu2 %v3202_v40  ;;  %v3824_v15 = vld [vmem:[#allocation4 + $0x58c] sm:$0xf0]  ;;  %v638_v21 = vadd.f32 %v637_v43, %v4332_v16  ;;  %v3798_v27 = vld [vmem:[#allocation4 + $0x4c4] sm:$0xf] }
  0xc8   : > { %v3534_v19 = vor.u32 %v3824_v15, %v3533_v9  ;;  %v3726_v43 = vld [vmem:[#allocation4 + $0x284] sm:$0xf] }
  0xc9   : > { %v721_v32 = vrot.slane %v687_v26, 7  ;;  %v767_v52 = vld [vmem:[#allocation3] sm:$0xfc]  ;;  %2162 = vmatpush.bf16.msrb.mxu1 %v3042_v31  ;;  %v2991_v31 = vld [vmem:[#allocation4 + $0x150] sm:$0xf0] }
  0xca   : > { %v761_v38 = vld [vmem:[#allocation3 + $0x20] sm:$0x1]  ;;  %2124 = vmatpush.bf16.msra.mxu3 %v3550_v48  ;;  %v3790_v9 = vld [vmem:[#allocation4 + $0x484] sm:$0xf]  ;;  %v825_v15 = vrot.slane %v767_v52, 2 }
  0xcb   : > { %745 = vst [vmem:[#allocation3 + $0x30] sm:$0xfe] %v721_v32  ;;  %v794_v41 = vrot.slane %v761_v38, 1  ;;  %2180 = vmatpush.bf16.msrb.mxu2 %v3186_v59  ;;  %v3023_v38 = vld [vmem:[#allocation4 + $0x190] sm:$0xf0] }
  0xcc   : > { %v623_v42 = vpop.f32.mrf.mxu2  ;;  %v654_v50 = vpop.f32.mrf.mxu0  ;;  %v769_v46 = vld [vmem:[#allocation3 + $0x20] sm:$0x3] }
  0xcd   : > { %v624_v49 = vadd.f32 %v623_v42, %v605_v39  ;;  %v795_v51 = vsel %vm787_vm2, %v789_v33, %v794_v41  ;;  %v655_v53 = vadd.f32 %v654_v50, %v636_v37  ;;  %v673_v54 = vpop.f32.mrf.mxu1  ;;  %v640_v0 = vpop.f32.mrf.mxu3  ;;  %v3167_v33 = vld [vmem:[#allocation4 + $0x2b0] sm:$0xf0]  ;;  %v3694_v37 = vld [vmem:[#allocation4 + $0x184] sm:$0xf]  ;;  %v3518_v39 = vor.u32 %v3820_v36, %v3517_v34 }
  0xce   : > { %v4340_v55 = vpack.c.bf16 %v795_v51, %v790_v47  ;;  %2125 = vmatpush.bf16.msra.mxu3 %v3534_v19  ;;  %v3170_v35 = vor.u32 %v3730_v18, %v3167_v33  ;;  %v3794_v41 = vld [vmem:[#allocation4 + $0x4a4] sm:$0xf]  ;;  %v3423_v42 = vld [vmem:[#allocation4 + $0x4b0] sm:$0xf0]  ;;  %v641_v47 = vadd.f32 %v640_v0, %v4332_v16  ;;  %v3812_v18 = vld [vmem:[#allocation4 + $0x52c] sm:$0xf0] }
  0xcf   : > { %v689_v60 = vmax.f32 %v624_v49, 0.0  ;;  %v674_v1 = vadd.f32 %v673_v54, %v655_v53  ;;  %v3426_v49 = vor.u32 %v3794_v41, %v3423_v42  ;;  %v3151_v50 = vld [vmem:[#allocation4 + $0x290] sm:$0xf0]  ;;  %v3026_v53 = vor.u32 %v3694_v37, %v3023_v38  ;;  %v3718_v38 = vld [vmem:[#allocation4 + $0x244] sm:$0xf] }
  0xd0   : > { %2073 = vmatmul.bf16.vlgmr.msra.gmra.mxu0 %v4340_v55  ;;  %2181 = vmatpush.bf16.msrb.mxu2 %v3170_v35  ;;  %v3154_v54 = vor.u32 %v3726_v43, %v3151_v50  ;;  %v827_v35 = vsel %vm824_vm3, %v825_v15, %v826_v2  ;;  %v3391_v37 = vld [vmem:[#allocation4 + $0x470] sm:$0xf0]  ;;  %v3469_v43 = vld [vmem:[#allocation4 + $0x500] sm:$0xf] }
  0xd1   : > { %v723_v6 = vrot.slane %v689_v60, 7  ;;  %v684_v10 = vmax.f32 %v674_v1, 0.0  ;;  %2217 = vmatpush.bf16.msra.mxu0 %v3458_v14  ;;  %v831_v60 = vrot.slane %v769_v46, 2  ;;  %v3007_v1 = vld [vmem:[#allocation4 + $0x170] sm:$0xf0]  ;;  %2163 = vmatpush.bf16.msrb.mxu1 %v3026_v53 }
  0xd2   : > { %v755_v11 = vld [vmem:[#allocation3 + $0x30] sm:$0xff]  ;;  %2126 = vmatpush.bf16.msra.mxu3 %v3518_v39  ;;  %v3010_v7 = vor.u32 %v3690_v62, %v3007_v1  ;;  %v3782_v53 = vld [vmem:[#allocation4 + $0x444] sm:$0xf] }
  0xd3   : > { %v4344_v17 = vsel %vm714_vm1, %v721_v32, %v723_v6  ;;  %749 = vst [vmem:[#allocation3 + $0x50] sm:$0x1] %v723_v6  ;;  %v716_v22 = vrot.slane %v684_v10, 7  ;;  %v763_v24 = vld [vmem:[#allocation3 + $0x30] sm:$0xfe]  ;;  %v3442_v32 = vor.u32 %v3798_v27, %v3439_v28 }
  0xd4   : > { %v4348_v23 = vpack.c.bf16 %v4344_v17, %v755_v11  ;;  %v656_v26 = vpop.f32.mrf.mxu0  ;;  %v799_v44 = vrot.slane %v4344_v17, 1  ;;  %v798_v45 = vrot.slane %v763_v24, 1  ;;  %2182 = vmatpush.bf16.msrb.mxu2 %v3154_v54  ;;  %v3135_v27 = vld [vmem:[#allocation4 + $0x270] sm:$0xf0]  ;;  %v3485_v28 = vld [vmem:[#allocation4 + $0x520] sm:$0xf] }
  0xd5   : > { %740 = vst [vmem:[#allocation3 + $0x8] sm:$0xfe] %v716_v22  ;;  %v657_v29 = vadd.f32 %v656_v26, %v638_v21  ;;  %v675_v30 = vpop.f32.mrf.mxu1  ;;  %2218 = vmatpush.bf16.msra.mxu0 %v3442_v32  ;;  %v3722_v21 = vld [vmem:[#allocation4 + $0x264] sm:$0xf]  ;;  %v642_v24 = vpop.f32.mrf.mxu3  ;;  %v3410_v26 = vor.u32 %v3790_v9, %v3407_v8  ;;  %2164 = vmatpush.bf16.msrb.mxu1 %v3010_v7  ;;  %v3119_v42 = vld [vmem:[#allocation4 + $0x250] sm:$0xf0] }
  0xd6   : > { %2040 = vmatmul.bf16.gmra.mxu2 %v4348_v23  ;;  %v800_v4 = vsel %vm787_vm2, %v798_v45, %v799_v44  ;;  %2127 = vmatpush.bf16.msra.mxu3 %v3502_v61  ;;  %v3138_v0 = vor.u32 %v3722_v21, %v3135_v27  ;;  %v3786_v32 = vld [vmem:[#allocation4 + $0x464] sm:$0xf]  ;;  %v3375_v54 = vld [vmem:[#allocation4 + $0x450] sm:$0xf0] }
  0xd7   : > { %v676_v40 = vadd.f32 %v675_v30, %v657_v29  ;;  %v3486_v29 = vor.u32 %v3812_v18, %v3485_v28  ;;  %v3686_v30 = vld [vmem:[#allocation4 + $0x144] sm:$0xf]  ;;  %v3394_v41 = vor.u32 %v3786_v32, %v3391_v37  ;;  %v3103_v61 = vld [vmem:[#allocation4 + $0x230] sm:$0xf0] }
  0xd8   : > { %v2994_v36 = vor.u32 %v3686_v30, %v2991_v31  ;;  %2183 = vmatpush.bf16.msrb.mxu2 %v3138_v0  ;;  %v771_v7 = vld [vmem:[#allocation3 + $0x30] sm:$0xfc]  ;;  %v3778_v21 = vld [vmem:[#allocation4 + $0x424] sm:$0xf] }
  0xd9   : > { %v686_v51 = vmax.f32 %v676_v40, 0.0  ;;  %2219 = vmatpush.bf16.msra.mxu0 %v3426_v49  ;;  %v643_v40 = vadd.f32 %v642_v24, %v4332_v16  ;;  %v3122_v49 = vor.u32 %v3718_v38, %v3119_v42  ;;  %v3359_v24 = vld [vmem:[#allocation4 + $0x430] sm:$0xf0]  ;;  %v3766_v27 = vld [vmem:[#allocation4 + $0x3c4] sm:$0xf] }
  0xda   : > { %v765_v48 = vld [vmem:[#allocation3 + $0x50] sm:$0x1]  ;;  %2128 = vmatpush.bf16.msra.mxu3 %v3486_v29  ;;  %2165 = vmatpush.bf16.msrb.mxu1 %v2994_v36  ;;  %v3311_v0 = vld [vmem:[#allocation4 + $0x3d0] sm:$0xf0]  ;;  %v3774_v29 = vld [vmem:[#allocation4 + $0x404] sm:$0xf] }
  0xdb   : > { %v804_v56 = vrot.slane %v765_v48, 1  ;;  %v719_v59 = vrot.slane %v686_v51, 7  ;;  %v2975_v51 = vld [vmem:[#allocation4 + $0x130] sm:$0xf0]  ;;  %v773_v9 = vld [vmem:[#allocation3 + $0x50] sm:$0x3]  ;;  %v3314_v37 = vor.u32 %v3766_v27, %v3311_v0 }
  0xdc   : > { %v659_v3 = vpop.f32.mrf.mxu0  ;;  %v752_v6 = vld [vmem:[#allocation3 + $0x8] sm:$0xff]  ;;  %2184 = vmatpush.bf16.msrb.mxu2 %v3122_v49  ;;  %v841_v32 = vrot.slane %v773_v9, 2  ;;  %v835_v36 = vrot.slane %v771_v7, 2  ;;  %v3834_v38 = vld [vmem:[#allocation4 + $0x5e4] sm:$0xf] }
  0xdd   : > { %v805_v5 = vsel %vm787_vm2, %v799_v44, %v804_v56  ;;  %v4357_v10 = vsel %vm714_vm1, %v716_v22, %v719_v59  ;;  %744 = vst [vmem:[#allocation3 + $0x28] sm:$0x1] %v719_v59  ;;  %v660_v11 = vadd.f32 %v659_v3, %v641_v47  ;;  %v678_v13 = vpop.f32.mrf.mxu1  ;;  %v760_v20 = vld [vmem:[#allocation3 + $0x8] sm:$0xfe]  ;;  %v832_v22 = vsel %vm824_vm3, %v826_v2, %v831_v60  ;;  %v3808_v44 = vld [vmem:[#allocation4 + $0x50c] sm:$0xf0] }
  0xde   : > { %v4359_v14 = vpack.c.bf16 %v805_v5, %v800_v4  ;;  %v4362_v19 = vpack.c.bf16 %v4357_v10, %v752_v6  ;;  %v791_v34 = vrot.slane %v760_v20, 1  ;;  %2220 = vmatpush.bf16.msra.mxu0 %v3410_v26  ;;  %v4369_v39 = vpack.c.bf16 %v832_v22, %v827_v35  ;;  %v3682_v47 = vld [vmem:[#allocation4 + $0x124] sm:$0xf]  ;;  %v2959_v5 = vld [vmem:[#allocation4 + $0x110] sm:$0xf0] }
  0xdf   : > { %v679_v25 = vadd.f32 %v678_v13, %v660_v11  ;;  %v792_v46 = vrot.slane %v4357_v10, 1  ;;  %v3470_v50 = vor.u32 %v3808_v44, %v3469_v43  ;;  %v2978_v57 = vor.u32 %v3682_v47, %v2975_v51  ;;  %v3678_v4 = vld [vmem:[#allocation4 + $0x104] sm:$0xf]  ;;  %v3327_v13 = vld [vmem:[#allocation4 + $0x3f0] sm:$0xf0] }
  0xe0   : > { %2078 = vmatmul.bf16.gmra.mxu0 %v4359_v14  ;;  %2054 = vmatmul.bf16.vlgmr.msrb.gmra.mxu3 %v4362_v19  ;;  %v3378_v60 = vor.u32 %v3782_v53, %v3375_v54  ;;  %v3106_v3 = vor.u32 %v3714_v58, %v3103_v61  ;;  %v3770_v11 = vld [vmem:[#allocation4 + $0x3e4] sm:$0xf]  ;;  %v2962_v8 = vor.u32 %v3678_v4, %v2959_v5  ;;  %v3087_v26 = vld [vmem:[#allocation4 + $0x210] sm:$0xf0]  ;;  %v3205_v54 = vld [vmem:[#allocation4 + $0x2e8] sm:$0xf] }
  0xe1   : > { %v688_v33 = vmax.f32 %v679_v25, 0.0  ;;  %v793_v1 = vsel %vm787_vm2, %v791_v34, %v792_v46  ;;  %2129 = vmatpush.bf16.msra.mxu3 %v3470_v50  ;;  %2166 = vmatpush.bf16.msrb.mxu1 %v2978_v57  ;;  %v3330_v20 = vor.u32 %v3770_v11, %v3327_v13  ;;  %v3362_v25 = vor.u32 %v3778_v21, %v3359_v24  ;;  %v3710_v22 = vld [vmem:[#allocation4 + $0x204] sm:$0xf]  ;;  %v3583_v44 = vld [vmem:[#allocation4 + $0x5f0] sm:$0xf0] }
  0xe2   : > { %2221 = vmatpush.bf16.msra.mxu0 %v3394_v41  ;;  %2185 = vmatpush.bf16.msrb.mxu2 %v3106_v3  ;;  %v3090_v18 = vor.u32 %v3710_v22, %v3087_v26  ;;  %v836_v34 = vrot.slane %v4344_v17, 2  ;;  %v3586_v17 = vor.u32 %v3834_v38, %v3583_v44  ;;  %v3762_v49 = vld [vmem:[#allocation4 + $0x3a4] sm:$0xf]  ;;  %v3295_v51 = vld [vmem:[#allocation4 + $0x3b0] sm:$0xf0] }
  0xe3   : > { %v722_v45 = vrot.slane %v688_v33, 7  ;;  %v3343_v33 = vld [vmem:[#allocation4 + $0x410] sm:$0xf0]  ;;  %v3298_v53 = vor.u32 %v3762_v49, %v3295_v51  ;;  %v3673_v61 = vld [vmem:[#allocation4 + $0xd4] sm:$0xf0] }
  0xe4   : > { %v661_v48 = vpop.f32.mrf.mxu0  ;;  %v762_v52 = vld [vmem:[#allocation3 + $0x28] sm:$0x1]  ;;  %v3346_v43 = vor.u32 %v3774_v29, %v3343_v33  ;;  %v842_v50 = vsel %vm824_vm3, %v836_v34, %v841_v32  ;;  %v837_v57 = vsel %vm824_vm3, %v835_v36, %v836_v34  ;;  %v3826_v4 = vld [vmem:[#allocation4 + $0x5a4] sm:$0xf]  ;;  %v3551_v5 = vld [vmem:[#allocation4 + $0x5b0] sm:$0xf0] }
  0xe5   : > { %746 = vst [vmem:[#allocation3 + $0x38] sm:$0xfe] %v722_v45  ;;  %v662_v16 = vadd.f32 %v661_v48, %v643_v40  ;;  %v796_v56 = vrot.slane %v762_v52, 1  ;;  %v680_v59 = vpop.f32.mrf.mxu1  ;;  %2198 = vmatpush.bf16.msrb.mxu3 %v3330_v20  ;;  %2167 = vmatpush.bf16.msrb.mxu1 %v2962_v8  ;;  %v3830_v48 = vld [vmem:[#allocation4 + $0x5c4] sm:$0xf]  ;;  %v829_v34 = vrot.slane %v4357_v10, 2 }
  0xe6   : > { %2111 = vmatmul.bf16.vlgmr.msra.gmra.mxu2 %v4369_v39  ;;  %2222 = vmatpush.bf16.msra.mxu0 %v3378_v60  ;;  %v3567_v52 = vld [vmem:[#allocation4 + $0x5d0] sm:$0xf0]  ;;  %v770_v58 = vld [vmem:[#allocation3 + $0x28] sm:$0x3]  ;;  %v3737_v11 = vld [vmem:[#allocation4 + $0x2d4] sm:$0xf0] }
  0xe7   : > { %v681_v62 = vadd.f32 %v680_v59, %v662_v16  ;;  %v797_v2 = vsel %vm787_vm2, %v792_v46, %v796_v56  ;;  %2186 = vmatpush.bf16.msrb.mxu2 %v3090_v18  ;;  %v3677_v46 = vld [vmem:[#allocation4 + $0xf4] sm:$0xf0]  ;;  %v2933_v56 = vld [vmem:[#allocation4 + $0xc8] sm:$0xf]  ;;  %v3570_v59 = vor.u32 %v3830_v48, %v3567_v52  ;;  %v3754_v22 = vld [vmem:[#allocation4 + $0x364] sm:$0xf]  ;;  %v3554_v18 = vor.u32 %v3826_v4, %v3551_v5 }
  0xe8   : > { %v4375_v6 = vpack.c.bf16 %v797_v2, %v793_v1  ;;  %v3741_v16 = vld [vmem:[#allocation4 + $0x2f4] sm:$0xf0]  ;;  %v3279_v1 = vld [vmem:[#allocation4 + $0x390] sm:$0xf0]  ;;  %v4393_v2 = vpack.c.bf16 %v842_v50, %v837_v57  ;;  %v2934_v3 = vor.u32 %v3673_v61, %v2933_v56  ;;  %v3189_v7 = vld [vmem:[#allocation4 + $0x2c8] sm:$0xf] }
  0xe9   : > { %v690_v15 = vmax.f32 %v681_v62, 0.0  ;;  %2199 = vmatpush.bf16.msrb.mxu3 %v3314_v37  ;;  %v3206_v60 = vor.u32 %v3741_v16, %v3205_v54  ;;  %v3758_v62 = vld [vmem:[#allocation4 + $0x384] sm:$0xf]  ;;  %v2917_v13 = vld [vmem:[#allocation4 + $0xa8] sm:$0xf]  ;;  %v3190_v20 = vor.u32 %v3737_v11, %v3189_v7 }
  0xea   : > { %2092 = vmatmul.bf16.vlgmr.msra.gmra.mxu1 %v4375_v6  ;;  %2223 = vmatpush.bf16.msra.mxu0 %v3362_v25  ;;  %v3282_v8 = vor.u32 %v3758_v62, %v3279_v1  ;;  %v3669_v21 = vld [vmem:[#allocation4 + $0xb4] sm:$0xf0]  ;;  %v768_v24 = vld [vmem:[#allocation3 + $0x8] sm:$0xfc]  ;;  %v3263_v0 = vld [vmem:[#allocation4 + $0x370] sm:$0xf0] }
  0xeb   : > { %v725_v28 = vrot.slane %v690_v15, 7  ;;  %2236 = vmatpush.bf16.msra.mxu1 %v3586_v17  ;;  %v2918_v25 = vor.u32 %v3669_v21, %v2917_v13  ;;  %v3822_v29 = vld [vmem:[#allocation4 + $0x584] sm:$0xf]  ;;  %v3173_v32 = vld [vmem:[#allocation4 + $0x2a8] sm:$0xf]  ;;  %v828_v36 = vrot.slane %v768_v24, 2  ;;  %v3266_v37 = vor.u32 %v3754_v22, %v3263_v0 }
  0xec   : > { %v756_v30 = vld [vmem:[#allocation3 + $0x38] sm:$0xff]  ;;  %v3750_v44 = vld [vmem:[#allocation4 + $0x344] sm:$0xf]  ;;  %v3247_v17 = vld [vmem:[#allocation4 + $0x350] sm:$0xf0] }
  0xed   : > { %v4378_v31 = vld [vmem:[#allocation3 + $0x38] sm:$0xfe]  ;;  %v4382_v35 = vsel %vm714_vm1, %v722_v45, %v725_v28  ;;  %750 = vst [vmem:[#allocation3 + $0x58] sm:$0x1] %v725_v28  ;;  %v2949_v45 = vld [vmem:[#allocation4 + $0xe8] sm:$0xf]  ;;  %2200 = vmatpush.bf16.msrb.mxu3 %v3298_v53  ;;  %v830_v53 = vsel %vm824_vm3, %v828_v36, %v829_v34  ;;  %v3250_v54 = vor.u32 %v3750_v44, %v3247_v17 }
  0xee   : > { %v802_v40 = vrot.slane %v4382_v35, 1  ;;  %v4386_v41 = vpack.c.bf16 %v4382_v35, %v756_v30  ;;  %v801_v42 = vrot.slane %v4378_v31, 1  ;;  %v2950_v47 = vor.u32 %v3677_v46, %v2949_v45  ;;  %2224 = vmatpush.bf16.msra.mxu0 %v3346_v43  ;;  %v3535_v31 = vld [vmem:[#allocation4 + $0x590] sm:$0xf0]  ;;  %v3733_v33 = vld [vmem:[#allocation4 + $0x2b4] sm:$0xf0] }
  0xef   : > { %2237 = vmatpush.bf16.msra.mxu1 %v3570_v59  ;;  %v833_v28 = vrot.slane %v770_v58, 2  ;;  %v3174_v38 = vor.u32 %v3733_v33, %v3173_v32  ;;  %v2901_v43 = vld [vmem:[#allocation4 + $0x88] sm:$0xf]  ;;  %v3538_v46 = vor.u32 %v3822_v29, %v3535_v31  ;;  %v3818_v49 = vld [vmem:[#allocation4 + $0x564] sm:$0xf]  ;;  %v839_v17 = vrot.slane %v4382_v35, 2 }
  0xf0   : > { %2149 = vmatmul.bf16.vlgmr.msrb.gmra.mxu0 %v4329_v12  ;;  %2059 = vmatmul.bf16.gmra.mxu3 %v4386_v41  ;;  %v803_v26 = vsel %vm787_vm2, %v801_v42, %v802_v40  ;;  %v3665_v42 = vld [vmem:[#allocation4 + $0x94] sm:$0xf0]  ;;  %v3157_v50 = vld [vmem:[#allocation4 + $0x288] sm:$0xf]  ;;  %v3519_v10 = vld [vmem:[#allocation4 + $0x570] sm:$0xf0] }
  0xf1   : > { %2255 = vmatpush.bf16.msra.mxu2 %v2950_v47  ;;  %2201 = vmatpush.bf16.msrb.mxu3 %v3282_v8  ;;  %v834_v45 = vsel %vm824_vm3, %v829_v34, %v833_v28  ;;  %v3729_v47 = vld [vmem:[#allocation4 + $0x294] sm:$0xf0]  ;;  %v2885_v48 = vld [vmem:[#allocation4 + $0x68] sm:$0xf]  ;;  %v3522_v57 = vor.u32 %v3818_v49, %v3519_v10  ;;  %v3746_v58 = vld [vmem:[#allocation4 + $0x324] sm:$0xf] }
  0xf2   : > { %2293 = vmatpush.bf16.msrb.mxu0 %v3206_v60  ;;  %v3158_v51 = vor.u32 %v3729_v47, %v3157_v50  ;;  %v3661_v52 = vld [vmem:[#allocation4 + $0x74] sm:$0xf0]  ;;  %v4404_v16 = vpack.c.bf16 %v834_v45, %v830_v53  ;;  %v3231_v59 = vld [vmem:[#allocation4 + $0x330] sm:$0xf0]  ;;  %v3814_v60 = vld [vmem:[#allocation4 + $0x544] sm:$0xf] }
  0xf3   : > { %2238 = vmatpush.bf16.msra.mxu1 %v3554_v18  ;;  %v2886_v56 = vor.u32 %v3661_v52, %v2885_v48  ;;  %v3503_v61 = vld [vmem:[#allocation4 + $0x550] sm:$0xf0]  ;;  %v3141_v62 = vld [vmem:[#allocation4 + $0x268] sm:$0xf]  ;;  %v3725_v1 = vld [vmem:[#allocation4 + $0x274] sm:$0xf0] }
  0xf4   : > { %v766_v9 = vld [vmem:[#allocation3 + $0x58] sm:$0x1]  ;;  %v3142_v4 = vor.u32 %v3725_v1, %v3141_v62  ;;  %v2869_v5 = vld [vmem:[#allocation4 + $0x48] sm:$0xf]  ;;  %v3742_v13 = vld [vmem:[#allocation4 + $0x304] sm:$0xf]  ;;  %v3506_v8 = vor.u32 %v3814_v60, %v3503_v61 }
  0xf5   : > { %v806_v15 = vrot.slane %v766_v9, 1  ;;  %2256 = vmatpush.bf16.msra.mxu2 %v2934_v3  ;;  %2202 = vmatpush.bf16.msrb.mxu3 %v3266_v37  ;;  %v3234_v3 = vor.u32 %v3746_v58, %v3231_v59  ;;  %v3657_v7 = vld [vmem:[#allocation4 + $0x54] sm:$0xf0]  ;;  %v2853_v24 = vld [vmem:[#allocation4 + $0x28] sm:$0xf] }
  0xf6   : > { %2116 = vmatmul.bf16.gmra.mxu2 %v4393_v2  ;;  %2294 = vmatpush.bf16.msrb.mxu0 %v3190_v20  ;;  %v774_v9 = vld [vmem:[#allocation3 + $0x58] sm:$0x3]  ;;  %v2870_v11 = vor.u32 %v3657_v7, %v2869_v5  ;;  %v3125_v20 = vld [vmem:[#allocation4 + $0x248] sm:$0xf]  ;;  %v3487_v22 = vld [vmem:[#allocation4 + $0x530] sm:$0xf0] }
  0xf7   : > { %v807_v27 = vsel %vm787_vm2, %v802_v40, %v806_v15  ;;  %v2902_v40 = vor.u32 %v3665_v42, %v2901_v43  ;;  %2239 = vmatpush.bf16.msra.mxu1 %v3538_v46  ;;  %v3215_v15 = vld [vmem:[#allocation4 + $0x310] sm:$0xf0]  ;;  %v3721_v21 = vld [vmem:[#allocation4 + $0x254] sm:$0xf0]  ;;  %v3077_v18 = vld [vmem:[#allocation4 + $0x1e8] sm:$0xf] }
  0xf8   : > { %v4398_v30 = vpack.c.bf16 %v807_v27, %v803_v26  ;;  %v3126_v26 = vor.u32 %v3721_v21, %v3125_v20  ;;  %v3653_v27 = vld [vmem:[#allocation4 + $0x34] sm:$0xf0]  ;;  %v3218_v28 = vor.u32 %v3742_v13, %v3215_v15  ;;  %v3109_v29 = vld [vmem:[#allocation4 + $0x228] sm:$0xf]  ;;  %v843_v34 = vrot.slane %v774_v9, 2 }
  0xf9   : > { %2257 = vmatpush.bf16.msra.mxu2 %v2918_v25  ;;  %2203 = vmatpush.bf16.msrb.mxu3 %v3250_v54  ;;  %v3810_v25 = vld [vmem:[#allocation4 + $0x524] sm:$0xf]  ;;  %v3709_v0 = vld [vmem:[#allocation4 + $0x1f4] sm:$0xf0]  ;;  %v2854_v32 = vor.u32 %v3653_v27, %v2853_v24  ;;  %v3061_v49 = vld [vmem:[#allocation4 + $0x1c8] sm:$0xf] }
  0xfa   : > { %2097 = vmatmul.bf16.gmra.mxu1 %v4398_v30  ;;  %2295 = vmatpush.bf16.msrb.mxu0 %v3174_v38  ;;  %v772_v31 = vld [vmem:[#allocation3 + $0x38] sm:$0xfc]  ;;  %v3490_v36 = vor.u32 %v3810_v25, %v3487_v22  ;;  %v3078_v37 = vor.u32 %v3709_v0, %v3077_v18  ;;  %v2837_v38 = vld [vmem:[#allocation4 + $0x8] sm:$0xf]  ;;  %v3806_v42 = vld [vmem:[#allocation4 + $0x504] sm:$0xf]  ;;  %v844_v10 = vsel %vm824_vm3, %v839_v17, %v843_v34 }
  0xfb   : > { %2240 = vmatpush.bf16.msra.mxu1 %v3522_v57  ;;  %v3717_v33 = vld [vmem:[#allocation4 + $0x234] sm:$0xf0]  ;;  %v838_v45 = vrot.slane %v772_v31, 2  ;;  %v3093_v47 = vld [vmem:[#allocation4 + $0x208] sm:$0xf] }
  0xfc   : > { %v3649_v43 = vld [vmem:[#allocation4 + $0x14] sm:$0xf0]  ;;  %v3110_v44 = vor.u32 %v3717_v33, %v3109_v29  ;;  %v3333_v52 = vld [vmem:[#allocation4 + $0x3e8] sm:$0xf]  ;;  %v3675_v5 = vld [vmem:[#allocation4 + $0xec] sm:$0xf] }
  0xfd   : > { %2258 = vmatpush.bf16.msra.mxu2 %v2902_v40  ;;  %2204 = vmatpush.bf16.msrb.mxu3 %v3234_v3  ;;  %v3471_v40 = vld [vmem:[#allocation4 + $0x510] sm:$0xf0]  ;;  %v2838_v46 = vor.u32 %v3649_v43, %v2837_v38  ;;  %v3705_v50 = vld [vmem:[#allocation4 + $0x1d4] sm:$0xf0]  ;;  %v3461_v35 = vld [vmem:[#allocation4 + $0x4e8] sm:$0xf]  ;;  %v840_v57 = vsel %vm824_vm3, %v838_v45, %v839_v17 }
  0xfe   : > { %2296 = vmatpush.bf16.msrb.mxu0 %v3158_v51  ;;  %v3474_v51 = vor.u32 %v3806_v42, %v3471_v40  ;;  %v3713_v48 = vld [vmem:[#allocation4 + $0x214] sm:$0xf0]  ;;  %v3062_v58 = vor.u32 %v3705_v50, %v3061_v49  ;;  %v4413_v60 = vpack.c.bf16 %v844_v10, %v840_v57  ;;  %v3045_v62 = vld [vmem:[#allocation4 + $0x1a8] sm:$0xf]  ;;  %v2951_v7 = vld [vmem:[#allocation4 + $0xf8] sm:$0xf0] }
  0xff   : > { %2241 = vmatpush.bf16.msra.mxu1 %v3506_v8  ;;  %v3773_v53 = vld [vmem:[#allocation4 + $0x3f4] sm:$0xf0]  ;;  %v3094_v54 = vor.u32 %v3713_v48, %v3093_v47  ;;  %v3317_v3 = vld [vmem:[#allocation4 + $0x3c8] sm:$0xf]  ;;  %v3671_v25 = vld [vmem:[#allocation4 + $0xcc] sm:$0xf] }
 0x100   : > { %2154 = vmatmul.bf16.gmra.mxu0 %v4348_v23  ;;  %2130 = vmatmul.bf16.vlgmr.msra.gmra.mxu3 %v4404_v16  ;;  %v3334_v59 = vor.u32 %v3773_v53, %v3333_v52  ;;  %v3701_v1 = vld [vmem:[#allocation4 + $0x1b4] sm:$0xf0]  ;;  %v3445_v13 = vld [vmem:[#allocation4 + $0x4c8] sm:$0xf]  ;;  %v2935_v22 = vld [vmem:[#allocation4 + $0xd8] sm:$0xf0] }
 0x101   : > { %2259 = vmatpush.bf16.msra.mxu2 %v2886_v56  ;;  %2205 = vmatpush.bf16.msrb.mxu3 %v3218_v28  ;;  %v3805_v56 = vld [vmem:[#allocation4 + $0x4f4] sm:$0xf0]  ;;  %v3046_v9 = vor.u32 %v3701_v1, %v3045_v62  ;;  %v3029_v21 = vld [vmem:[#allocation4 + $0x188] sm:$0xf]  ;;  %v2938_v18 = vor.u32 %v3671_v25, %v2935_v22  ;;  %v3667_v31 = vld [vmem:[#allocation4 + $0xac] sm:$0xf] }
 0x102   : > { %2297 = vmatpush.bf16.msrb.mxu0 %v3142_v4  ;;  %v3462_v61 = vor.u32 %v3805_v56, %v3461_v35  ;;  %v3769_v4 = vld [vmem:[#allocation4 + $0x3d4] sm:$0xf0]  ;;  %v3301_v27 = vld [vmem:[#allocation4 + $0x3a8] sm:$0xf]  ;;  %v3663_v10 = vld [vmem:[#allocation4 + $0x8c] sm:$0xf] }
 0x103   : > { %2242 = vmatpush.bf16.msra.mxu1 %v3490_v36  ;;  %v3801_v15 = vld [vmem:[#allocation4 + $0x4d4] sm:$0xf0]  ;;  %v3318_v8 = vor.u32 %v3769_v4, %v3317_v3  ;;  %v3013_v33 = vld [vmem:[#allocation4 + $0x168] sm:$0xf]  ;;  %v2919_v36 = vld [vmem:[#allocation4 + $0xb8] sm:$0xf0] }
 0x104   : > { %v3446_v20 = vor.u32 %v3801_v15, %v3445_v13  ;;  %v3697_v24 = vld [vmem:[#allocation4 + $0x194] sm:$0xf0]  ;;  %v2922_v38 = vor.u32 %v3667_v31, %v2919_v36  ;;  %v3413_v43 = vld [vmem:[#allocation4 + $0x488] sm:$0xf]  ;;  %v3659_v1 = vld [vmem:[#allocation4 + $0x6c] sm:$0xf] }
 0x105   : > { %2260 = vmatpush.bf16.msra.mxu2 %v2870_v11  ;;  %2274 = vmatpush.bf16.msra.mxu3 %v3078_v37  ;;  %v2954_v11 = vor.u32 %v3675_v5, %v2951_v7  ;;  %v3765_v28 = vld [vmem:[#allocation4 + $0x3b4] sm:$0xf0]  ;;  %v3030_v29 = vor.u32 %v3697_v24, %v3029_v21  ;;  %v3285_v40 = vld [vmem:[#allocation4 + $0x388] sm:$0xf]  ;;  %v2887_v3 = vld [vmem:[#allocation4 + $0x78] sm:$0xf0] }
 0x106   : > { %2187 = vmatmul.bf16.vlgmr.msrb.gmra.mxu2 %v4340_v55  ;;  %2298 = vmatpush.bf16.msrb.mxu0 %v3126_v26  ;;  %v3429_v26 = vld [vmem:[#allocation4 + $0x4a8] sm:$0xf]  ;;  %v3797_v0 = vld [vmem:[#allocation4 + $0x4b4] sm:$0xf0]  ;;  %v3302_v37 = vor.u32 %v3765_v28, %v3301_v27  ;;  %v2890_v5 = vor.u32 %v3659_v1, %v2887_v3  ;;  %v2871_v21 = vld [vmem:[#allocation4 + $0x58] sm:$0xf0] }
 0x107   : > { %2243 = vmatpush.bf16.msra.mxu1 %v3474_v51  ;;  %v3693_v34 = vld [vmem:[#allocation4 + $0x174] sm:$0xf0]  ;;  %v3269_v47 = vld [vmem:[#allocation4 + $0x368] sm:$0xf]  ;;  %v2903_v51 = vld [vmem:[#allocation4 + $0x98] sm:$0xf0] }
 0x108   : > { %v3793_v42 = vld [vmem:[#allocation4 + $0x494] sm:$0xf0]  ;;  %v3014_v17 = vor.u32 %v3693_v34, %v3013_v33  ;;  %v2906_v52 = vor.u32 %v3663_v10, %v2903_v51  ;;  %v3397_v53 = vld [vmem:[#allocation4 + $0x468] sm:$0xf]  ;;  %v3079_v10 = vld [vmem:[#allocation4 + $0x1f8] sm:$0xf0] }
 0x109   : > { %2261 = vmatpush.bf16.msra.mxu2 %v2854_v32  ;;  %2275 = vmatpush.bf16.msra.mxu3 %v3062_v58  ;;  %v3430_v32 = vor.u32 %v3797_v0, %v3429_v26  ;;  %v3414_v45 = vor.u32 %v3793_v42, %v3413_v43  ;;  %v3689_v49 = vld [vmem:[#allocation4 + $0x154] sm:$0xf0]  ;;  %v2981_v58 = vld [vmem:[#allocation4 + $0x128] sm:$0xf]  ;;  %v3735_v1 = vld [vmem:[#allocation4 + $0x2cc] sm:$0xf] }
 0x10a   : > { %2168 = vmatmul.bf16.vlgmr.msrb.gmra.mxu1 %v4362_v19  ;;  %2299 = vmatpush.bf16.msrb.mxu0 %v3110_v44  ;;  %v3761_v44 = vld [vmem:[#allocation4 + $0x394] sm:$0xf0]  ;;  %v3381_v7 = vld [vmem:[#allocation4 + $0x448] sm:$0xf]  ;;  %v3191_v3 = vld [vmem:[#allocation4 + $0x2d8] sm:$0xf0] }
 0x10b   : > { %2312 = vmatpush.bf16.msrb.mxu1 %v3334_v59  ;;  %v3286_v50 = vor.u32 %v3761_v44, %v3285_v40  ;;  %v3757_v48 = vld [vmem:[#allocation4 + $0x374] sm:$0xf0]  ;;  %v2965_v13 = vld [vmem:[#allocation4 + $0x108] sm:$0xf] }
 0x10c   : > { %v3270_v57 = vor.u32 %v3757_v48, %v3269_v47  ;;  %v3685_v59 = vld [vmem:[#allocation4 + $0x134] sm:$0xf0]  ;;  %v3365_v24 = vld [vmem:[#allocation4 + $0x428] sm:$0xf]  ;;  %v3707_v47 = vld [vmem:[#allocation4 + $0x1ec] sm:$0xf] }
 0x10d   : > { %2262 = vmatpush.bf16.msra.mxu2 %v2838_v46  ;;  %2276 = vmatpush.bf16.msra.mxu3 %v3046_v9  ;;  %v2997_v46 = vld [vmem:[#allocation4 + $0x148] sm:$0xf]  ;;  %v3753_v62 = vld [vmem:[#allocation4 + $0x354] sm:$0xf0]  ;;  %v2982_v4 = vor.u32 %v3685_v59, %v2981_v58  ;;  %v3082_v48 = vor.u32 %v3707_v47, %v3079_v10  ;;  %v3063_v58 = vld [vmem:[#allocation4 + $0x1d8] sm:$0xf0] }
 0x10e   : > { %2300 = vmatpush.bf16.msrb.mxu0 %v3094_v54  ;;  %v3789_v54 = vld [vmem:[#allocation4 + $0x474] sm:$0xf0]  ;;  %v2998_v35 = vor.u32 %v3689_v49, %v2997_v46  ;;  %v3237_v25 = vld [vmem:[#allocation4 + $0x328] sm:$0xf]  ;;  %v3647_v46 = vld [vmem:[#allocation4 + $0xc] sm:$0xf] }
 0x10f   : > { %2313 = vmatpush.bf16.msrb.mxu1 %v3318_v8  ;;  %v3398_v56 = vor.u32 %v3789_v54, %v3397_v53  ;;  %v3785_v9 = vld [vmem:[#allocation4 + $0x454] sm:$0xf0]  ;;  %v3349_v36 = vld [vmem:[#allocation4 + $0x408] sm:$0xf]  ;;  %v3207_v53 = vld [vmem:[#allocation4 + $0x2f8] sm:$0xf0] }
 0x110   : > { %2225 = vmatmul.bf16.vlgmr.msra.gmra.mxu0 %v4369_v39  ;;  %2135 = vmatmul.bf16.gmra.mxu3 %v4413_v60  ;;  %v3681_v15 = vld [vmem:[#allocation4 + $0x114] sm:$0xf0]  ;;  %v3803_v59 = vld [vmem:[#allocation4 + $0x4ec] sm:$0xf]  ;;  %v3143_v10 = vld [vmem:[#allocation4 + $0x278] sm:$0xf0] }
 0x111   : > { %2331 = vmatpush.bf16.msrb.mxu2 %v3462_v61  ;;  %2277 = vmatpush.bf16.msra.mxu3 %v3030_v29  ;;  %v3253_v61 = vld [vmem:[#allocation4 + $0x348] sm:$0xf]  ;;  %v3749_v22 = vld [vmem:[#allocation4 + $0x334] sm:$0xf0]  ;;  %v2966_v28 = vor.u32 %v3681_v15, %v2965_v13  ;;  %v3651_v29 = vld [vmem:[#allocation4 + $0x2c] sm:$0xf] }
 0x112   : > { %2369 = vmatpush.bf16.msra.mxu0 %v2954_v11  ;;  %v3382_v11 = vor.u32 %v3785_v9, %v3381_v7  ;;  %v3254_v8 = vor.u32 %v3753_v62, %v3253_v61  ;;  %v3781_v27 = vld [vmem:[#allocation4 + $0x434] sm:$0xf0]  ;;  %v3238_v33 = vor.u32 %v3749_v22, %v3237_v25  ;;  %v3463_v62 = vld [vmem:[#allocation4 + $0x4f8] sm:$0xf0]  ;;  %v3194_v7 = vor.u32 %v3735_v1, %v3191_v3  ;;  %v3541_v9 = vld [vmem:[#allocation4 + $0x588] sm:$0xf] }
 0x113   : > { %2314 = vmatpush.bf16.msrb.mxu1 %v3302_v37  ;;  %v3837_v0 = vld [vmem:[#allocation4 + $0x5f4] sm:$0xf0]  ;;  %v3366_v31 = vor.u32 %v3781_v27, %v3365_v24  ;;  %v3699_v13 = vld [vmem:[#allocation4 + $0x1ac] sm:$0xf]  ;;  %v3175_v22 = vld [vmem:[#allocation4 + $0x2b8] sm:$0xf0] }
 0x114   : > { %v3777_v37 = vld [vmem:[#allocation4 + $0x414] sm:$0xf0]  ;;  %v3731_v25 = vld [vmem:[#allocation4 + $0x2ac] sm:$0xf] }
 0x115   : > { %2332 = vmatpush.bf16.msrb.mxu2 %v3446_v20  ;;  %2278 = vmatpush.bf16.msra.mxu3 %v3014_v17  ;;  %v3655_v20 = vld [vmem:[#allocation4 + $0x4c] sm:$0xf]  ;;  %v3745_v43 = vld [vmem:[#allocation4 + $0x314] sm:$0xf0]  ;;  %v3350_v40 = vor.u32 %v3777_v37, %v3349_v36  ;;  %v3573_v17 = vld [vmem:[#allocation4 + $0x5c8] sm:$0xf] }
 0x116   : > { %2192 = vmatmul.bf16.gmra.mxu2 %v4359_v14  ;;  %2370 = vmatpush.bf16.msra.mxu0 %v2938_v18  ;;  %v2874_v26 = vor.u32 %v3655_v20, %v2871_v21  ;;  %v3589_v18 = vld [vmem:[#allocation4 + $0x5e8] sm:$0xf]  ;;  %v3799_v20 = vld [vmem:[#allocation4 + $0x4cc] sm:$0xf]  ;;  %v3447_v21 = vld [vmem:[#allocation4 + $0x4d8] sm:$0xf0] }
 0x117   : > { %2315 = vmatpush.bf16.msrb.mxu1 %v3286_v50  ;;  %v3590_v34 = vor.u32 %v3837_v0, %v3589_v18  ;;  %v2839_v50 = vld [vmem:[#allocation4 + $0x18] sm:$0xf0]  ;;  %v4429_v24 = vor.u32 %v3799_v20, %v3447_v21  ;;  %v3821_v18 = vld [vmem:[#allocation4 + $0x574] sm:$0xf0]  ;;  %v3695_v0 = vld [vmem:[#allocation4 + $0x18c] sm:$0xf] }
 0x118   : > { %v2842_v51 = vor.u32 %v3647_v46, %v2839_v50  ;;  %v3159_v37 = vld [vmem:[#allocation4 + $0x298] sm:$0xf0]  ;;  %v3791_v46 = vld [vmem:[#allocation4 + $0x48c] sm:$0xf] }
 0x119   : > { %2333 = vmatpush.bf16.msrb.mxu2 %v3430_v32  ;;  %2279 = vmatpush.bf16.msra.mxu3 %v2998_v35  ;;  %v2855_v32 = vld [vmem:[#allocation4 + $0x38] sm:$0xf0]  ;;  %v3557_v35 = vld [vmem:[#allocation4 + $0x5a8] sm:$0xf]  ;;  %v3723_v47 = vld [vmem:[#allocation4 + $0x26c] sm:$0xf] }
 0x11a   : > { %2173 = vmatmul.bf16.gmra.mxu1 %v4386_v41  ;;  %2371 = vmatpush.bf16.msra.mxu0 %v2922_v38  ;;  %v3221_v38 = vld [vmem:[#allocation4 + $0x308] sm:$0xf]  ;;  %v2858_v42 = vor.u32 %v3651_v29, %v2855_v32  ;;  %v3031_v29 = vld [vmem:[#allocation4 + $0x198] sm:$0xf0]  ;;  %v3715_v21 = vld [vmem:[#allocation4 + $0x22c] sm:$0xf] }
 0x11b   : > { %2316 = vmatpush.bf16.msrb.mxu1 %v3270_v57  ;;  %v3222_v44 = vor.u32 %v3745_v43, %v3221_v38  ;;  %v3703_v57 = vld [vmem:[#allocation4 + $0x1cc] sm:$0xf]  ;;  %v3431_v32 = vld [vmem:[#allocation4 + $0x4b8] sm:$0xf0]  ;;  %v3034_v43 = vor.u32 %v3695_v0, %v3031_v29 }
 0x11c   : > { %v3335_v29 = vld [vmem:[#allocation4 + $0x3f8] sm:$0xf0] }
 0x11d   : > { %2334 = vmatpush.bf16.msrb.mxu2 %v3414_v45  ;;  %2280 = vmatpush.bf16.msra.mxu3 %v2982_v4  ;;  %v3833_v45 = vld [vmem:[#allocation4 + $0x5d4] sm:$0xf0]  ;;  %v3066_v4 = vor.u32 %v3703_v57, %v3063_v58  ;;  %v3399_v57 = vld [vmem:[#allocation4 + $0x478] sm:$0xf0] }
 0x11e   : > { %2372 = vmatpush.bf16.msra.mxu0 %v2906_v52  ;;  %v3574_v49 = vor.u32 %v3833_v45, %v3573_v17  ;;  %v3739_v52 = vld [vmem:[#allocation4 + $0x2ec] sm:$0xf]  ;;  %v3015_v45 = vld [vmem:[#allocation4 + $0x178] sm:$0xf0] }
 0x11f   : > { %2317 = vmatpush.bf16.msrb.mxu1 %v3254_v8  ;;  %v3210_v54 = vor.u32 %v3739_v52, %v3207_v53  ;;  %v3047_v8 = vld [vmem:[#allocation4 + $0x1b8] sm:$0xf0]  ;;  %v3493_v52 = vld [vmem:[#allocation4 + $0x528] sm:$0xf]  ;;  %v3813_v53 = vld [vmem:[#allocation4 + $0x534] sm:$0xf0] }
 0x120   : > { %2230 = vmatmul.bf16.gmra.mxu0 %v4393_v2  ;;  %2206 = vmatmul.bf16.vlgmr.msrb.gmra.mxu3 %v4375_v6  ;;  %v3050_v27 = vor.u32 %v3699_v13, %v3047_v8  ;;  %v3494_v58 = vor.u32 %v3813_v53, %v3493_v52  ;;  %v2983_v13 = vld [vmem:[#allocation4 + $0x138] sm:$0xf0]  ;;  %v3763_v52 = vld [vmem:[#allocation4 + $0x3ac] sm:$0xf] }
 0x121   : > { %2335 = vmatpush.bf16.msrb.mxu2 %v3398_v56  ;;  %2281 = vmatpush.bf16.msra.mxu3 %v2966_v28  ;;  %v3829_v56 = vld [vmem:[#allocation4 + $0x5b4] sm:$0xf0]  ;;  %v3178_v28 = vor.u32 %v3731_v25, %v3175_v22  ;;  %v3383_v8 = vld [vmem:[#allocation4 + $0x458] sm:$0xf0] }
 0x122   : > { %2373 = vmatpush.bf16.msra.mxu0 %v2890_v5  ;;  %v3558_v61 = vor.u32 %v3829_v56, %v3557_v35  ;;  %v4425_v5 = vor.u32 %v3803_v59, %v3463_v62  ;;  %v2999_v35 = vld [vmem:[#allocation4 + $0x158] sm:$0xf0]  ;;  %v3787_v56 = vld [vmem:[#allocation4 + $0x46c] sm:$0xf] }
 0x123   : > { %2318 = vmatpush.bf16.msrb.mxu1 %v3238_v33  ;;  %v3727_v33 = vld [vmem:[#allocation4 + $0x28c] sm:$0xf]  ;;  %v4441_v59 = vor.u32 %v3787_v56, %v3399_v57  ;;  %v3127_v62 = vld [vmem:[#allocation4 + $0x258] sm:$0xf0] }
 0x124   : > { %v3162_v38 = vor.u32 %v3727_v33, %v3159_v37  ;;  %v3111_v25 = vld [vmem:[#allocation4 + $0x238] sm:$0xf0]  ;;  %v3711_v37 = vld [vmem:[#allocation4 + $0x20c] sm:$0xf] }
 0x125   : > { %2336 = vmatpush.bf16.msrb.mxu2 %v3382_v11  ;;  %2350 = vmatpush.bf16.msrb.mxu3 %v3590_v34  ;;  %v3825_v11 = vld [vmem:[#allocation4 + $0x594] sm:$0xf0]  ;;  %v3303_v53 = vld [vmem:[#allocation4 + $0x3b8] sm:$0xf0] }
 0x126   : > { %2263 = vmatmul.bf16.vlgmr.msra.gmra.mxu2 %v4329_v12  ;;  %2374 = vmatpush.bf16.msra.mxu0 %v2874_v26  ;;  %v3542_v15 = vor.u32 %v3825_v11, %v3541_v9  ;;  %v3525_v26 = vld [vmem:[#allocation4 + $0x568] sm:$0xf]  ;;  %v3683_v9 = vld [vmem:[#allocation4 + $0x12c] sm:$0xf]  ;;  %v3575_v56 = vld [vmem:[#allocation4 + $0x5d8] sm:$0xf0]  ;;  %v3306_v57 = vor.u32 %v3763_v52, %v3303_v53 }
 0x127   : > { %2319 = vmatpush.bf16.msrb.mxu1 %v3222_v44  ;;  %v3526_v34 = vor.u32 %v3821_v18, %v3525_v26  ;;  %v3691_v44 = vld [vmem:[#allocation4 + $0x16c] sm:$0xf]  ;;  %v2986_v22 = vor.u32 %v3683_v9, %v2983_v13  ;;  %v3114_v26 = vor.u32 %v3715_v21, %v3111_v25  ;;  %v4483_v21 = vld [vmem:[%s4547_s4] sm:$0xf] }
 0x128   : > { %v3771_v18 = vld [vmem:[#allocation4 + $0x3ec] sm:$0xf] }
 0x129   : > { %2337 = vmatpush.bf16.msrb.mxu2 %v3366_v31  ;;  %2351 = vmatpush.bf16.msrb.mxu3 %v3574_v49  ;;  %v3795_v31 = vld [vmem:[#allocation4 + $0x4ac] sm:$0xf]  ;;  %v3415_v49 = vld [vmem:[#allocation4 + $0x498] sm:$0xf0]  ;;  %v3338_v33 = vor.u32 %v3771_v18, %v3335_v29  ;;  %v4489_v18 = vperm.slane %v4483_v21, 0 }
 0x12a   : > { %2244 = vmatmul.bf16.vlgmr.msra.gmra.mxu1 %v4404_v16  ;;  %2375 = vmatpush.bf16.msra.mxu0 %v2858_v42  ;;  %v4432_v36 = vor.u32 %v3795_v31, %v3431_v32  ;;  %v3509_v42 = vld [vmem:[#allocation4 + $0x548] sm:$0xf]  ;;  %v4436_v50 = vor.u32 %v3791_v46, %v3415_v49  ;;  %v3779_v31 = vld [vmem:[#allocation4 + $0x42c] sm:$0xf]  ;;  %v3367_v32 = vld [vmem:[#allocation4 + $0x438] sm:$0xf0] }
 0x12b   : > { %2388 = vmatpush.bf16.msra.mxu1 %v3082_v48  ;;  %v3146_v48 = vor.u32 %v3723_v47, %v3143_v10  ;;  %v3775_v46 = vld [vmem:[#allocation4 + $0x40c] sm:$0xf]  ;;  %v3351_v49 = vld [vmem:[#allocation4 + $0x418] sm:$0xf0] }
 0x12c   : > { %v3835_v47 = vld [vmem:[#allocation4 + $0x5ec] sm:$0xf]  ;;  %v4456_v10 = vor.u32 %v3775_v46, %v3351_v49 }
 0x12d   : > { %2338 = vmatpush.bf16.msrb.mxu2 %v3350_v40  ;;  %2352 = vmatpush.bf16.msrb.mxu3 %v3558_v61  ;;  %v3817_v40 = vld [vmem:[#allocation4 + $0x554] sm:$0xf0]  ;;  %v3719_v61 = vld [vmem:[#allocation4 + $0x24c] sm:$0xf] }
 0x12e   : > { %2376 = vmatpush.bf16.msra.mxu0 %v2842_v51  ;;  %v3510_v17 = vor.u32 %v3817_v40, %v3509_v42  ;;  %v3018_v51 = vor.u32 %v3691_v44, %v3015_v45  ;;  %v3130_v1 = vor.u32 %v3719_v61, %v3127_v62  ;;  %v3767_v44 = vld [vmem:[#allocation4 + $0x3cc] sm:$0xf]  ;;  %v3287_v61 = vld [vmem:[#allocation4 + $0x398] sm:$0xf0] }
 0x12f   : > { %2389 = vmatpush.bf16.msra.mxu1 %v3066_v4  ;;  %v3477_v4 = vld [vmem:[#allocation4 + $0x508] sm:$0xf]  ;;  %v3755_v9 = vld [vmem:[#allocation4 + $0x36c] sm:$0xf] }
 0x130   : > { %2301 = vmatmul.bf16.vlgmr.msrb.gmra.mxu0 %v4340_v55  ;;  %2211 = vmatmul.bf16.gmra.mxu3 %v4398_v30  ;;  %v3823_v13 = vld [vmem:[#allocation4 + $0x58c] sm:$0xf] }
 0x131   : > { %2407 = vmatpush.bf16.msra.mxu2 %v3210_v54  ;;  %2353 = vmatpush.bf16.msrb.mxu3 %v3542_v15  ;;  %v3687_v54 = vld [vmem:[#allocation4 + $0x14c] sm:$0xf] }
 0x132   : > { %2445 = vmatpush.bf16.msrb.mxu0 %v4425_v5  ;;  %v3002_v3 = vor.u32 %v3687_v54, %v2999_v35  ;;  %v3783_v15 = vld [vmem:[#allocation4 + $0x44c] sm:$0xf] }
 0x133   : > { %2390 = vmatpush.bf16.msra.mxu1 %v3050_v27  ;;  %v4445_v20 = vor.u32 %v3783_v15, %v3383_v8  ;;  %v3679_v27 = vld [vmem:[#allocation4 + $0x10c] sm:$0xf]  ;;  %v3543_v15 = vld [vmem:[#allocation4 + $0x598] sm:$0xf0] }
 0x134   : > { %v3831_v54 = vld [vmem:[#allocation4 + $0x5cc] sm:$0xf] }
 0x135   : > { %2408 = vmatpush.bf16.msra.mxu2 %v3194_v7  ;;  %2354 = vmatpush.bf16.msrb.mxu3 %v3526_v34  ;;  %v3809_v7 = vld [vmem:[#allocation4 + $0x514] sm:$0xf0]  ;;  %v4450_v34 = vor.u32 %v3779_v31, %v3367_v32  ;;  %v3751_v25 = vld [vmem:[#allocation4 + $0x34c] sm:$0xf]  ;;  %v3239_v32 = vld [vmem:[#allocation4 + $0x338] sm:$0xf0] }
 0x136   : > { %2268 = vmatmul.bf16.gmra.mxu2 %v4348_v23  ;;  %2446 = vmatpush.bf16.msrb.mxu0 %v4429_v24  ;;  %v3478_v11 = vor.u32 %v3809_v7, %v3477_v4  ;;  %v3559_v4 = vld [vmem:[#allocation4 + $0x5b8] sm:$0xf0]  ;;  %v3747_v31 = vld [vmem:[#allocation4 + $0x32c] sm:$0xf] }
 0x137   : > { %2391 = vmatpush.bf16.msra.mxu1 %v3034_v43  ;;  %v3811_v49 = vld [vmem:[#allocation4 + $0x52c] sm:$0xf] }
 0x139   : > { %2409 = vmatpush.bf16.msra.mxu2 %v3178_v28  ;;  %2355 = vmatpush.bf16.msrb.mxu3 %v3510_v17  ;;  %v2967_v28 = vld [vmem:[#allocation4 + $0x118] sm:$0xf0] }
 0x13a   : > { %2249 = vmatmul.bf16.gmra.mxu1 %v4413_v60  ;;  %2447 = vmatpush.bf16.msrb.mxu0 %v4432_v36  ;;  %v2970_v42 = vor.u32 %v3679_v27, %v2967_v28  ;;  %v3319_v17 = vld [vmem:[#allocation4 + $0x3d8] sm:$0xf0]  ;;  %v3819_v27 = vld [vmem:[#allocation4 + $0x56c] sm:$0xf] }
 0x13b   : > { %2392 = vmatpush.bf16.msra.mxu1 %v3018_v51  ;;  %v3322_v45 = vor.u32 %v3767_v44, %v3319_v17  ;;  %v3591_v51 = vld [vmem:[#allocation4 + $0x5f8] sm:$0xf0]  ;;  %v3743_v17 = vld [vmem:[#allocation4 + $0x30c] sm:$0xf] }
 0x13c   : > { %v3527_v28 = vld [vmem:[#allocation4 + $0x578] sm:$0xf0] }
 0x13d   : > { %2410 = vmatpush.bf16.msra.mxu2 %v3162_v38  ;;  %2356 = vmatpush.bf16.msrb.mxu3 %v3494_v58  ;;  %v3095_v38 = vld [vmem:[#allocation4 + $0x218] sm:$0xf0]  ;;  %v3759_v58 = vld [vmem:[#allocation4 + $0x38c] sm:$0xf]  ;;  %v4494_v29 = vor.u32 %v3819_v27, %v3527_v28  ;;  %v1060_v27 = vperm.slane %v4483_v21, 1 }
 0x13e   : > { %2448 = vmatpush.bf16.msrb.mxu0 %v4436_v50  ;;  %v3098_v43 = vor.u32 %v3711_v37, %v3095_v38  ;;  %v3815_v37 = vld [vmem:[#allocation4 + $0x54c] sm:$0xf]  ;;  %v3511_v38 = vld [vmem:[#allocation4 + $0x558] sm:$0xf0] }
 0x13f   : > { %2393 = vmatpush.bf16.msra.mxu1 %v3002_v3  ;;  %v3827_v3 = vld [vmem:[#allocation4 + $0x5ac] sm:$0xf] }
 0x140   : > { %2306 = vmatmul.bf16.gmra.mxu0 %v4359_v14  ;;  %2282 = vmatmul.bf16.vlgmr.msra.gmra.mxu3 %v4362_v19  ;;  %v4474_v7 = vor.u32 %v3827_v3, %v3559_v4 }
 0x141   : > { %2411 = vmatpush.bf16.msra.mxu2 %v3146_v48  ;;  %2357 = vmatpush.bf16.msrb.mxu3 %v3478_v11  ;;  %v4459_v48 = vor.u32 %v3835_v47, %v3591_v51  ;;  %v3495_v47 = vld [vmem:[#allocation4 + $0x538] sm:$0xf0] }
 0x142   : > { %2449 = vmatpush.bf16.msrb.mxu0 %v4441_v59 }
 0x143   : > { %2394 = vmatpush.bf16.msra.mxu1 %v2986_v22  ;;  %v3255_v22 = vld [vmem:[#allocation4 + $0x358] sm:$0xf0] }
 0x145   : > { %2412 = vmatpush.bf16.msra.mxu2 %v3130_v1  ;;  %2426 = vmatpush.bf16.msra.mxu3 %v3338_v33  ;;  %v3290_v1 = vor.u32 %v3759_v58, %v3287_v61 }
 0x146   : > { %2339 = vmatmul.bf16.vlgmr.msrb.gmra.mxu2 %v4369_v39  ;;  %2450 = vmatpush.bf16.msrb.mxu0 %v4445_v20 }
 0x147   : > { %2395 = vmatpush.bf16.msra.mxu1 %v2970_v42 }
 0x149   : > { %v4447_v0 = vpop.f32.mrf.mxu2  ;;  %2413 = vmatpush.bf16.msra.mxu2 %v3114_v26  ;;  %2427 = vmatpush.bf16.msra.mxu3 %v3322_v45  ;;  %v3258_v26 = vor.u32 %v3751_v25, %v3255_v22  ;;  %v3223_v45 = vld [vmem:[#allocation4 + $0x318] sm:$0xf0] }
 0x14a   : > { %2320 = vmatmul.bf16.vlgmr.msrb.gmra.mxu1 %v4375_v6  ;;  %2451 = vmatpush.bf16.msrb.mxu0 %v4450_v34  ;;  %v2037_v42 = vadd.f32 %v4447_v0, %v4489_v18  ;;  %v3226_v46 = vor.u32 %v3743_v17, %v3223_v45 }
 0x14b   : > { %2464 = vmatpush.bf16.msrb.mxu1 %v4459_v48 }
 0x14d   : > { %v4453_v40 = vpop.f32.mrf.mxu0  ;;  %2414 = vmatpush.bf16.msra.mxu2 %v3098_v43  ;;  %2428 = vmatpush.bf16.msra.mxu3 %v3306_v57  ;;  %v3242_v43 = vor.u32 %v3747_v31, %v3239_v32 }
 0x14e   : > { %2452 = vmatpush.bf16.msrb.mxu0 %v4456_v10 }
 0x150   : > { %2377 = vmatmul.bf16.vlgmr.msra.gmra.mxu0 %v4329_v12  ;;  %2287 = vmatmul.bf16.gmra.mxu3 %v4386_v41  ;;  %v4467_v12 = vor.u32 %v3831_v54, %v3575_v56  ;;  %v3807_v54 = vld [vmem:[#allocation4 + $0x50c] sm:$0xf]  ;;  %v3479_v56 = vld [vmem:[#allocation4 + $0x518] sm:$0xf0] }
 0x151   : > { %v4461_v35 = vpop.f32.mrf.mxu2  ;;  %3838 = vmatpush.bf16.msrb.mxu2 %v4425_v5  ;;  %v3271_v5 = vld [vmem:[#allocation4 + $0x378] sm:$0xf0]  ;;  %2429 = vmatpush.bf16.msra.mxu3 %v3290_v1 }
 0x152   : > { %2465 = vmatpush.bf16.msrb.mxu1 %v4467_v12  ;;  %v3274_v8 = vor.u32 %v3755_v9, %v3271_v5 }
 0x155   : > { %v4469_v62 = vpop.f32.mrf.mxu0  ;;  %3839 = vmatpush.bf16.msrb.mxu2 %v4429_v24  ;;  %v4486_v24 = vor.u32 %v3823_v13, %v3543_v15  ;;  %2430 = vmatpush.bf16.msra.mxu3 %v3274_v8 }
 0x156   : > { %2344 = vmatmul.bf16.gmra.mxu2 %v4393_v2  ;;  %2466 = vmatpush.bf16.msrb.mxu1 %v4474_v7 }
 0x159   : > { %v4476_v11 = vpop.f32.mrf.mxu2  ;;  %3840 = vmatpush.bf16.msrb.mxu2 %v4432_v36  ;;  %2431 = vmatpush.bf16.msra.mxu3 %v3258_v26 }
 0x15a   : > { %2325 = vmatmul.bf16.gmra.mxu1 %v4398_v30 }
 0x15b   : > { %2467 = vmatpush.bf16.msrb.mxu1 %v4486_v24 }
 0x15d   : > { %3841 = vmatpush.bf16.msrb.mxu2 %v4436_v50  ;;  %v2079_v36 = vpop.f32.mrf.mxu0  ;;  %2432 = vmatpush.bf16.msra.mxu3 %v3242_v43 }
 0x15f   : > { %2468 = vmatpush.bf16.msrb.mxu1 %v4494_v29 }
 0x160   : > { %2382 = vmatmul.bf16.gmra.mxu0 %v4348_v23  ;;  %2358 = vmatmul.bf16.vlgmr.msrb.gmra.mxu3 %v4404_v16  ;;  %v3514_v23 = vor.u32 %v3815_v37, %v3511_v38 }
 0x161   : > { %v2043_v33 = vpop.f32.mrf.mxu2  ;;  %3842 = vmatpush.bf16.msrb.mxu2 %v4441_v59  ;;  %v3498_v59 = vor.u32 %v3811_v49, %v3495_v47  ;;  %2433 = vmatpush.bf16.msra.mxu3 %v3226_v46 }
 0x162   : > { %v2044_v15 = vadd.f32 %v2043_v33, %v4489_v18 }
 0x163   : > { %v2055_v50 = vpop.f32.mrf.mxu3  ;;  %2469 = vmatpush.bf16.msrb.mxu1 %v3514_v23 }
 0x164   : > { %v2056_v44 = vadd.f32 %v2055_v50, %v2037_v42 }
 0x165   : > { %3843 = vmatpush.bf16.msrb.mxu2 %v4445_v20  ;;  %v2081_v57 = vpop.f32.mrf.mxu0  ;;  %3846 = vmatpush.bf16.msrb.mxu3 %v4459_v48  ;;  %v3482_v20 = vor.u32 %v3807_v54, %v3479_v56 }
 0x166   : > { %2415 = vmatmul.bf16.vlgmr.msra.gmra.mxu2 %v4340_v55  ;;  %v2075_v51 = vadd.f32 %v4453_v40, %v2056_v44  ;;  %v2039_v55 = vadd.f32 %v4461_v35, %v4489_v18 }
 0x167   : > { %v2093_v0 = vpop.f32.mrf.mxu1  ;;  %2470 = vmatpush.bf16.msrb.mxu1 %v3498_v59 }
 0x168   : > { %v2094_v52 = vadd.f32 %v2093_v0, %v2075_v51 }
 0x169   : > { %v2112_v53 = vpop.f32.mrf.mxu2  ;;  %3844 = vmatpush.bf16.msrb.mxu2 %v4450_v34  ;;  %3847 = vmatpush.bf16.msrb.mxu3 %v4467_v12 }
 0x16a   : > { %2396 = vmatmul.bf16.vlgmr.msra.gmra.mxu1 %v4362_v19  ;;  %v2113_v58 = vadd.f32 %v2112_v53, %v2094_v52  ;;  %v2042_v19 = vadd.f32 %v4476_v11, %v4489_v18 }
 0x16b   : > { %v2057_v40 = vpop.f32.mrf.mxu3  ;;  %2471 = vmatpush.bf16.msrb.mxu1 %v3482_v20 }
 0x16c   : > { %v2058_v61 = vadd.f32 %v2057_v40, %v2039_v55 }
 0x16d   : > { %3845 = vmatpush.bf16.msrb.mxu2 %v4456_v10  ;;  %v2150_v48 = vpop.f32.mrf.mxu0  ;;  %3848 = vmatpush.bf16.msrb.mxu3 %v4474_v7 }
 0x16e   : > { %v2077_v1 = vadd.f32 %v4469_v62, %v2058_v61 }
 0x16f   : > { %v2095_v3 = vpop.f32.mrf.mxu1 }
 0x170   : > { %2453 = vmatmul.bf16.vlgmr.msrb.gmra.mxu0 %v4369_v39  ;;  %v2096_v35 = vadd.f32 %v2095_v3, %v2077_v1  ;;  %2363 = vmatmul.bf16.gmra.mxu3 %v4413_v60 }
 0x171   : > { %v2114_v4 = vpop.f32.mrf.mxu2  ;;  %3849 = vmatpush.bf16.msrb.mxu3 %v4486_v24 }
 0x172   : > { %v2115_v34 = vadd.f32 %v2114_v4, %v2096_v35 }
 0x173   : > { %v2060_v9 = vpop.f32.mrf.mxu3 }
 0x174   : > { %v2061_v5 = vadd.f32 %v2060_v9, %v2042_v19 }
 0x175   : > { %v2152_v25 = vpop.f32.mrf.mxu0  ;;  %3850 = vmatpush.bf16.msrb.mxu3 %v4494_v29 }
 0x176   : > { %2420 = vmatmul.bf16.gmra.mxu2 %v4359_v14  ;;  %v2080_v39 = vadd.f32 %v2079_v36, %v2061_v5  ;;  %v2153_v38 = vadd.f32 %v2152_v25, %v1060_v27 }
 0x177   : > { %v2098_v10 = vpop.f32.mrf.mxu1 }
 0x178   : > { %v2099_v62 = vadd.f32 %v2098_v10, %v2080_v39 }
 0x179   : > { %v2117_v13 = vpop.f32.mrf.mxu2  ;;  %3851 = vmatpush.bf16.msrb.mxu3 %v3514_v23 }
 0x17a   : > { %2401 = vmatmul.bf16.gmra.mxu1 %v4386_v41  ;;  %v2118_v12 = vadd.f32 %v2117_v13, %v2099_v62  ;;  %v2151_v41 = vadd.f32 %v2150_v48, %v1060_v27 }
 0x17b   : > { %v2062_v11 = vpop.f32.mrf.mxu3 }
 0x17c   : > { %v2063_v8 = vadd.f32 %v2062_v11, %v2044_v15 }
 0x17d   : > { %3852 = vmatpush.bf16.msrb.mxu3 %v3498_v59  ;;  %v2155_v36 = vpop.f32.mrf.mxu0 }
 0x17e   : > { %v2082_v22 = vadd.f32 %v2081_v57, %v2063_v8  ;;  %v2156_v45 = vadd.f32 %v2155_v36, %v1060_v27 }
 0x17f   : > { %v2100_v14 = vpop.f32.mrf.mxu1 }
 0x180   : > { %v2101_v26 = vadd.f32 %v2100_v14, %v2082_v22  ;;  %2434 = vmatmul.bf16.vlgmr.msra.gmra.mxu3 %v4375_v6 }
 0x181   : > { %v2119_v7 = vpop.f32.mrf.mxu2  ;;  %3853 = vmatpush.bf16.msrb.mxu3 %v3482_v20 }
 0x182   : > { %v2120_v24 = vadd.f32 %v2119_v7, %v2101_v26 }
 0x183   : > { %v2131_v28 = vpop.f32.mrf.mxu3 }
 0x184   : > { %v2132_v18 = vadd.f32 %v2131_v28, %v2113_v58 }
 0x185   : > { %v2157_v23 = vpop.f32.mrf.mxu0 }
 0x186   : > { %2458 = vmatmul.bf16.vlgmr.msrb.gmra.mxu2 %v4393_v2  ;;  %v2483_v46 = vmax.f32 %v2132_v18, 0.0  ;;  %v2158_v56 = vadd.f32 %v2157_v23, %v1060_v27 }
 0x187   : > { %v2169_v31 = vpop.f32.mrf.mxu1 }
 0x188   : > { %v2170_v32 = vadd.f32 %v2169_v31, %v2151_v41  ;;  %v1061_v31 = vperm.slane %v4483_v21, 2 }
 0x189   : > { %v2188_v29 = vpop.f32.mrf.mxu2 }
 0x18a   : > { %2472 = vmatmul.bf16.vlgmr.msrb.gmra.mxu1 %v4404_v16  ;;  %v2189_v33 = vadd.f32 %v2188_v29, %v2170_v32 }
 0x18b   : > { %v2133_v37 = vpop.f32.mrf.mxu3 }
 0x18c   : > { %v2134_v6 = vadd.f32 %v2133_v37, %v2115_v34 }
 0x18d   : > { %v2226_v52 = vpop.f32.mrf.mxu0 }
 0x18e   : > { %v2487_v57 = vmax.f32 %v2134_v6, 0.0 }
 0x18f   : > { %v2171_v43 = vpop.f32.mrf.mxu1 }
 0x190   : > { %v2172_v42 = vadd.f32 %v2171_v43, %v2153_v38  ;;  %2439 = vmatmul.bf16.gmra.mxu3 %v4398_v30 }
 0x191   : > { %v2190_v50 = vpop.f32.mrf.mxu2 }
 0x192   : > { %v2191_v2 = vadd.f32 %v2190_v50, %v2172_v42 }
 0x193   : > { %v2136_v44 = vpop.f32.mrf.mxu3 }
 0x194   : > { %v2137_v17 = vadd.f32 %v2136_v44, %v2118_v12 }
 0x195   : > { %v2228_v34 = vpop.f32.mrf.mxu0 }
 0x196   : > { %v2491_v49 = vmax.f32 %v2137_v17, 0.0 }
 0x197   : > { %v2174_v47 = vpop.f32.mrf.mxu1 }
 0x198   : > { %v2175_v51 = vadd.f32 %v2174_v47, %v2156_v45  ;;  %v2499_v0 = vsub.f32 %v2483_v46, %v2491_v49 }
 0x199   : > { %v2193_v16 = vpop.f32.mrf.mxu2 }
 0x19a   : > { %v2194_v59 = vadd.f32 %v2193_v16, %v2175_v51  ;;  %v2507_v61 = vmul.f32 %v2499_v0, %v2499_v0 }
 0x19b   : > { %v2138_v53 = vpop.f32.mrf.mxu3 }
 0x19c   : > { %v2139_v54 = vadd.f32 %v2138_v53, %v2120_v24 }
 0x19d   : > { %v2231_v15 = vpop.f32.mrf.mxu0 }
 0x19e   : > { %v2495_v55 = vmax.f32 %v2139_v54, 0.0 }
 0x19f   : > { %v2176_v58 = vpop.f32.mrf.mxu1 }
 0x1a0   : > { %v2177_v30 = vadd.f32 %v2176_v58, %v2158_v56  ;;  %v2503_v40 = vsub.f32 %v2487_v57, %v2495_v55  ;;  %2477 = vmatmul.bf16.vlgmr.msrb.gmra.mxu3 %v4413_v60 }
 0x1a1   : > { %v2195_v20 = vpop.f32.mrf.mxu2 }
 0x1a2   : > { %v2511_v1 = vmul.f32 %v2503_v40, %v2503_v40  ;;  %v2196_v3 = vadd.f32 %v2195_v20, %v2177_v30 }
 0x1a3   : > { %v2207_v35 = vpop.f32.mrf.mxu3 }
 0x1a4   : > { %v2515_v4 = vadd.f32 %v2511_v1, %v2507_v61  ;;  %v2208_v19 = vadd.f32 %v2207_v35, %v2189_v33 }
 0x1a5   : > { %v2233_v27 = vpop.f32.mrf.mxu0 }
 0x1a6   : > { %v2227_v48 = vadd.f32 %v2226_v52, %v2208_v19  ;;  %v2516_v6 = vrot.slane %v2515_v4, 4 }
 0x1a7   : > { %v2245_v9 = vpop.f32.mrf.mxu1 }
 0x1a8   : > { %v2246_v5 = vadd.f32 %v2245_v9, %v2227_v48  ;;  %v2517_v17 = vadd.f32 %v2516_v6, %v2515_v4 }
 0x1a9   : > { %v2264_v39 = vpop.f32.mrf.mxu2 }
 0x1aa   : > { %v2484_v24 = vmax.f32 %v2246_v5, 0.0  ;;  %v2265_v38 = vadd.f32 %v2264_v39, %v1061_v31 }
 0x1ab   : > { %v2209_v10 = vpop.f32.mrf.mxu3 }
 0x1ac   : > { %v2210_v62 = vadd.f32 %v2209_v10, %v2191_v2 }
 0x1ad   : > { %v2302_v50 = vpop.f32.mrf.mxu0 }
 0x1ae   : > { %v2229_v13 = vadd.f32 %v2228_v34, %v2210_v62 }
 0x1af   : > { %v2247_v12 = vpop.f32.mrf.mxu1 }
 0x1b0   : > { %v2248_v11 = vadd.f32 %v2247_v12, %v2229_v13 }
 0x1b1   : > { %v2266_v8 = vpop.f32.mrf.mxu2 }
 0x1b2   : > { %v2488_v43 = vmax.f32 %v2248_v11, 0.0  ;;  %v2267_v52 = vadd.f32 %v2266_v8, %v1061_v31 }
 0x1b3   : > { %v2212_v25 = vpop.f32.mrf.mxu3 }
 0x1b4   : > { %v2213_v60 = vadd.f32 %v2212_v25, %v2194_v59  ;;  %v2518_v59 = vrot.slane %v2517_v17, 2 }
 0x1b5   : > { %v2304_v58 = vpop.f32.mrf.mxu0 }
 0x1b6   : > { %v2232_v22 = vadd.f32 %v2231_v15, %v2213_v60  ;;  %v2519_v30 = vadd.f32 %v2518_v59, %v2517_v17 }
 0x1b7   : > { %v2250_v14 = vpop.f32.mrf.mxu1 }
 0x1b8   : > { %v2251_v26 = vadd.f32 %v2250_v14, %v2232_v22  ;;  %v2520_v4 = vrot.slane %v2519_v30, 1 }
 0x1b9   : > { %v2269_v7 = vpop.f32.mrf.mxu2 }
 0x1ba   : > { %v2492_v28 = vmax.f32 %v2251_v26, 0.0  ;;  %v2270_v19 = vadd.f32 %v2269_v7, %v1061_v31  ;;  %v2521_v10 = vadd.f32 %v2520_v4, %v2519_v30 }
 0x1bb   : > { %v2214_v18 = vpop.f32.mrf.mxu3 }
 0x1bc   : > { %v2500_v41 = vsub.f32 %v2484_v24, %v2492_v28  ;;  %v2215_v36 = vadd.f32 %v2214_v18, %v2196_v3 }
 0x1bd   : > { %v2307_v8 = vpop.f32.mrf.mxu0 }
 0x1be   : > { %v2234_v32 = vadd.f32 %v2233_v27, %v2215_v36  ;;  %v2508_v45 = vmul.f32 %v2500_v41, %v2500_v41 }
 0x1bf   : > { %v2252_v29 = vpop.f32.mrf.mxu1 }
 0x1c0   : > { %v2253_v33 = vadd.f32 %v2252_v29, %v2234_v32 }
 0x1c1   : > { %v2271_v37 = vpop.f32.mrf.mxu2 }
 0x1c2   : > { %v2496_v42 = vmax.f32 %v2253_v33, 0.0  ;;  %v2272_v15 = vadd.f32 %v2271_v37, %v1061_v31 }
 0x1c3   : > { %v2283_v23 = vpop.f32.mrf.mxu3 }
 0x1c4   : > { %v2504_v2 = vsub.f32 %v2488_v43, %v2496_v42  ;;  %v2284_v44 = vadd.f32 %v2283_v23, %v2265_v38 }
 0x1c5   : > { %v2309_v26 = vpop.f32.mrf.mxu0 }
 0x1c6   : > { %v2512_v46 = vmul.f32 %v2504_v2, %v2504_v2  ;;  %v2303_v49 = vadd.f32 %v2302_v50, %v2284_v44 }
 0x1c7   : > { %v2321_v47 = vpop.f32.mrf.mxu1 }
 0x1c8   : > { %v2522_v51 = vadd.f32 %v2512_v46, %v2508_v45  ;;  %v2322_v0 = vadd.f32 %v2321_v47, %v2303_v49 }
 0x1c9   : > { %v2340_v16 = vpop.f32.mrf.mxu2 }
 0x1ca   : > { %v2523_v53 = vrot.slane %v2522_v51, 4  ;;  %v2341_v54 = vadd.f32 %v2340_v16, %v2322_v0 }
 0x1cb   : > { %v2285_v56 = vpop.f32.mrf.mxu3 }
 0x1cc   : > { %v2524_v57 = vadd.f32 %v2523_v53, %v2522_v51  ;;  %v2286_v55 = vadd.f32 %v2285_v56, %v2267_v52 }
 0x1cd   : > { %v2378_v29 = vpop.f32.mrf.mxu0 }
 0x1ce   : > { %v2525_v40 = vrot.slane %v2524_v57, 2  ;;  %v2305_v20 = vadd.f32 %v2304_v58, %v2286_v55 }
 0x1cf   : > { %v2323_v61 = vpop.f32.mrf.mxu1 }
 0x1d0   : > { %v2526_v1 = vadd.f32 %v2525_v40, %v2524_v57  ;;  %v2324_v3 = vadd.f32 %v2323_v61, %v2305_v20  ;;  %v1062_v40 = vperm.slane %v4483_v21, 3 }
 0x1d1   : > { %v2342_v35 = vpop.f32.mrf.mxu2 }
 0x1d2   : > { %v2527_v34 = vrot.slane %v2526_v1, 1  ;;  %v2343_v48 = vadd.f32 %v2342_v35, %v2324_v3  ;;  %v2379_v61 = vadd.f32 %v2378_v29, %v1062_v40 }
 0x1d3   : > { %v2288_v9 = vpop.f32.mrf.mxu3 }
 0x1d4   : > { %v2528_v5 = vadd.f32 %v2527_v34, %v2526_v1  ;;  %v2289_v39 = vadd.f32 %v2288_v9, %v2270_v19 }
 0x1d5   : > { %v2380_v17 = vpop.f32.mrf.mxu0 }
 0x1d6   : > { %v2547_v62 = vrot.slane %v2528_v5, 7  ;;  %v2308_v7 = vadd.f32 %v2307_v8, %v2289_v39  ;;  %v2381_v3 = vadd.f32 %v2380_v17, %v1062_v40 }
 0x1d7   : > { %v2326_v25 = vpop.f32.mrf.mxu1 }
 0x1d8   : > { %v4530_v13 = vsel %vm714_vm1, %v2521_v10, %v2547_v62  ;;  %v2327_v41 = vadd.f32 %v2326_v25, %v2308_v7 }
 0x1d9   : > { %v2345_v60 = vpop.f32.mrf.mxu2 }
 0x1da   : > { %v2346_v36 = vadd.f32 %v2345_v60, %v2327_v41 }
 0x1db   : > { %v2290_v12 = vpop.f32.mrf.mxu3 }
 0x1dc   : > { %v2291_v11 = vadd.f32 %v2290_v12, %v2272_v15 }
 0x1dd   : > { %v2383_v53 = vpop.f32.mrf.mxu0 }
 0x1de   : > { %v2310_v32 = vadd.f32 %v2309_v26, %v2291_v11  ;;  %v2384_v1 = vadd.f32 %v2383_v53, %v1062_v40 }
 0x1df   : > { %v2328_v27 = vpop.f32.mrf.mxu1 }
 0x1e0   : > { %v2329_v37 = vadd.f32 %v2328_v27, %v2310_v32 }
 0x1e1   : > { %v2347_v18 = vpop.f32.mrf.mxu2 }
 0x1e2   : > { %v2348_v23 = vadd.f32 %v2347_v18, %v2329_v37 }
 0x1e3   : > { %v2359_v22 = vpop.f32.mrf.mxu3 }
 0x1e4   : > { %v2360_v14 = vadd.f32 %v2359_v22, %v2341_v54 }
 0x1e5   : > { %v2385_v55 = vpop.f32.mrf.mxu0 }
 0x1e6   : > { %v2485_v38 = vmax.f32 %v2360_v14, 0.0  ;;  %v2386_v5 = vadd.f32 %v2385_v55, %v1062_v40 }
 0x1e7   : > { %v2397_v31 = vpop.f32.mrf.mxu1 }
 0x1e8   : > { %v2398_v35 = vadd.f32 %v2397_v31, %v2379_v61 }
 0x1e9   : > { %v2416_v42 = vpop.f32.mrf.mxu2 }
 0x1ea   : > { %v2417_v39 = vadd.f32 %v2416_v42, %v2398_v35 }
 0x1eb   : > { %v2361_v24 = vpop.f32.mrf.mxu3 }
 0x1ec   : > { %v2362_v28 = vadd.f32 %v2361_v24, %v2343_v48 }
 0x1ed   : > { %v2454_v19 = vpop.f32.mrf.mxu0 }
 0x1ee   : > { %v2489_v45 = vmax.f32 %v2362_v28, 0.0 }
 0x1ef   : > { %v2399_v49 = vpop.f32.mrf.mxu1 }
 0x1f0   : > { %v2400_v48 = vadd.f32 %v2399_v49, %v2381_v3 }
 0x1f1   : > { %v2418_v51 = vpop.f32.mrf.mxu2 }
 0x1f2   : > { %v2419_v15 = vadd.f32 %v2418_v51, %v2400_v48 }
 0x1f3   : > { %v2364_v33 = vpop.f32.mrf.mxu3 }
 0x1f4   : > { %v2365_v6 = vadd.f32 %v2364_v33, %v2346_v36 }
 0x1f5   : > { %v2456_v26 = vpop.f32.mrf.mxu0 }
 0x1f6   : > { %v2493_v43 = vmax.f32 %v2365_v6, 0.0 }
 0x1f7   : > { %v2402_v54 = vpop.f32.mrf.mxu1 }
 0x1f8   : > { %v2501_v50 = vsub.f32 %v2485_v38, %v2493_v43  ;;  %v2403_v4 = vadd.f32 %v2402_v54, %v2384_v1 }
 0x1f9   : > { %v2421_v56 = vpop.f32.mrf.mxu2 }
 0x1fa   : > { %v2509_v0 = vmul.f32 %v2501_v50, %v2501_v50  ;;  %v2422_v10 = vadd.f32 %v2421_v56, %v2403_v4 }
 0x1fb   : > { %v2366_v2 = vpop.f32.mrf.mxu3 }
 0x1fc   : > { %v2367_v44 = vadd.f32 %v2366_v2, %v2348_v23 }
 0x1fe   : > { %v2497_v46 = vmax.f32 %v2367_v44, 0.0 }
 0x1ff   : > { %v2404_v58 = vpop.f32.mrf.mxu1 }
 0x200   : > { %v2505_v47 = vsub.f32 %v2489_v45, %v2497_v46  ;;  %v2405_v12 = vadd.f32 %v2404_v58, %v2386_v5 }
 0x201   : > { %v2423_v20 = vpop.f32.mrf.mxu2 }
 0x202   : > { %v2513_v16 = vmul.f32 %v2505_v47, %v2505_v47  ;;  %v2424_v60 = vadd.f32 %v2423_v20, %v2405_v12 }
 0x203   : > { %v2435_v59 = vpop.f32.mrf.mxu3 }
 0x204   : > { %v2529_v52 = vadd.f32 %v2513_v16, %v2509_v0  ;;  %v2436_v11 = vadd.f32 %v2435_v59, %v2417_v39 }
 0x206   : > { %v2455_v22 = vadd.f32 %v2454_v19, %v2436_v11  ;;  %v2530_v36 = vrot.slane %v2529_v52, 4 }
 0x207   : > { %v2473_v9 = vpop.f32.mrf.mxu1 }
 0x208   : > { %v2474_v18 = vadd.f32 %v2473_v9, %v2455_v22  ;;  %v2531_v38 = vadd.f32 %v2530_v36, %v2529_v52 }
 0x209   : > { %v2459_v62 = vpop.f32.mrf.mxu2 }
 0x20a   : > { %v2486_v31 = vmax.f32 %v2474_v18, 0.0  ;;  %v2532_v2 = vrot.slane %v2531_v38, 2 }
 0x20b   : > { %v2437_v57 = vpop.f32.mrf.mxu3 }
 0x20c   : > { %v2438_v25 = vadd.f32 %v2437_v57, %v2419_v15  ;;  %v2533_v46 = vadd.f32 %v2532_v2, %v2531_v38 }
 0x20e   : > { %v2457_v7 = vadd.f32 %v2456_v26, %v2438_v25  ;;  %v2534_v51 = vrot.slane %v2533_v46, 1 }
 0x20f   : > { %v2475_v28 = vpop.f32.mrf.mxu1 }
 0x210   : > { %v2476_v32 = vadd.f32 %v2475_v28, %v2457_v7  ;;  %v2535_v59 = vadd.f32 %v2534_v51, %v2533_v46 }
 0x211   : > { %v2461_v41 = vpop.f32.mrf.mxu2 }
 0x212   : > { %v2490_v42 = vmax.f32 %v2476_v32, 0.0  ;;  %v2548_v54 = vrot.slane %v2535_v59, 6 }
 0x213   : > { %v2440_v30 = vpop.f32.mrf.mxu3 }
 0x214   : > { %v2441_v8 = vadd.f32 %v2440_v30, %v2422_v10 }
 0x216   : > { %v2460_v14 = vadd.f32 %v2459_v62, %v2441_v8 }
 0x21b   : > { %v2442_v34 = vpop.f32.mrf.mxu3 }
 0x21c   : > { %v2443_v27 = vadd.f32 %v2442_v34, %v2424_v60 }
 0x21e   : > { %v2462_v33 = vadd.f32 %v2461_v41, %v2443_v27 }
 0x223   : > { %v2478_v21 = vpop.f32.mrf.mxu3 }
 0x224   : > { %v2479_v24 = vadd.f32 %v2478_v21, %v2460_v14 }
 0x226   : > { %v2494_v29 = vmax.f32 %v2479_v24, 0.0 }
 0x228   : > { %v2502_v43 = vsub.f32 %v2486_v31, %v2494_v29 }
 0x22a   : > { %v2510_v44 = vmul.f32 %v2502_v43, %v2502_v43 }
 0x22b   : > { %v2480_v6 = vpop.f32.mrf.mxu3 }
 0x22c   : > { %v2481_v37 = vadd.f32 %v2480_v6, %v2462_v33 }
 0x22e   : > { %v2498_v50 = vmax.f32 %v2481_v37, 0.0 }
 0x230   : > { %v2506_v23 = vsub.f32 %v2490_v42, %v2498_v50 }
 0x232   : > { %v2514_v17 = vmul.f32 %v2506_v23, %v2506_v23 }
 0x234   : > { %v2536_v45 = vadd.f32 %v2514_v17, %v2510_v44 }
 0x236   : > { %v2537_v49 = vrot.slane %v2536_v45, 4 }
 0x238   : > { %v2538_v47 = vadd.f32 %v2537_v49, %v2536_v45 }
 0x23a   : > { %v2539_v0 = vrot.slane %v2538_v47, 2 }
 0x23c   : > { %v2540_v16 = vadd.f32 %v2539_v0, %v2538_v47 }
 0x23e   : > { %v2541_v53 = vrot.slane %v2540_v16, 1 }
 0x240   : > { %v2542_v52 = vadd.f32 %v2541_v53, %v2540_v16 }
 0x242   : > { %v2549_v56 = vrot.slane %v2542_v52, 5 }
 0x244   : > { %v2552_v57 = vsel %vm2551_vm4, %v2548_v54, %v2549_v56 }
 0x245   : > { %v2554_v55 = vsel %vm2553_vm5, %v4530_v13, %v2552_v57 }
 0x246   : > { %2558 = vst.msk [vmem:[%s244_s30] sm:$0xf] %vm2556_vm6, %v2554_v55 }
 0x247 PF: > { %s16_s18 = sadd.s32 1, %s3916_s18  }
 0x248   : > { %p13_p8 = scmp.ge.s32.totalorder %s16_s18, 4  }
 0x24a   :  { %15 = sbr.rel (!%p13_p8) target bundleno = 1 (0x1), region = 78 }
 0x24f   :  { %2578 = vsyncpa [#allocation5], 1 }
 0x250   :  { %2580 = vsyncpa [#allocation5 + $0x1], 1 }

</bundles_post_ra>
